<compile_context>
chip_gen: v5e
topology: v5e:2x2
jax: 0.10.0
libtpu: 0.0.40
codegen_flags: <defaults>
</compile_context>

<pallas_src>
import functools

import jax
import jax.numpy as jnp
from jax.experimental import pallas as pl
from jax.experimental.pallas import tpu as pltpu


# ----------------------------- Pallas kernel -------------------------------
def _cnn_kernel(xr_ref, wband_ref, bconv_ref, w1_ref, b1_ref, w2_ref, b2_ref,
                out_ref, *, kh, ph_out, n_even, half_cols):
    bb, _, cw = xr_ref.shape                  # (B_BLK, Hp, C*Wp)
    ncols = 2 * half_cols                     # (dj, pw, f) conv columns

    # ---- convolution as KH banded matmuls, split into the two h-pool slabs.
    # xr rows are stored even-h first then odd-h, so for every h0 = di + i the
    # PH required input rows are one contiguous sublane slice of length PH.
    acc = [None, None]                        # acc[di] : (bb*PH, 2*PW*F)
    for h0 in range(kh + 1):                  # h0 = di + i
        par = h0 % 2
        base = (n_even if par else 0) + h0 // 2
        lhs = xr_ref[:, base:base + ph_out, :].reshape(bb * ph_out, cw)
        for di in range(2):
            i = h0 - di
            if 0 <= i < kh:
                prod = jnp.dot(lhs, wband_ref[i],
                               preferred_element_type=jnp.float32)
                acc[di] = prod if acc[di] is None else acc[di] + prod

    # ---- 2x2 max pool: h-direction across the two accumulators, w-direction
    # across the two contiguous half_cols lane slabs.  Pure VPU maximum.
    m = jnp.maximum(acc[0], acc[1]).reshape(bb, ph_out, ncols)
    pooled = jnp.maximum(m[..., :half_cols], m[..., half_cols:])

    # Conv bias after the pool (exact: max(x+b) == max(x)+b), then ReLU.
    act = jnp.maximum(pooled + bconv_ref[...], 0.0)        # (bb, PH, PW*F)

    # Flatten to a lane-dense (bb, PH*PW*F) slab; fc1 weight columns were
    # permuted in the wrapper to this (ph, pw, f) order.
    # TODO(synk): if the bundle dump shows this sublane->lane relayout on the
    # critical path, replace it with per-ph matmul accumulation into fc1.
    flat = act.reshape(bb, ph_out * half_cols)

    # fc1 -> dropout(p=0 is identity) -> relu -> fc2 (classes padded to 128).
    h = jnp.dot(flat, w1_ref[...], preferred_element_type=jnp.float32)
    h = jnp.maximum(h + b1_ref[...], 0.0)
    # TODO(synk): dropout with p > 0 would need pltpu.prng_random_bits masking.
    logits = jnp.dot(h, w2_ref[...], preferred_element_type=jnp.float32)
    out_ref[...] = logits + b2_ref[...]


# ------------------------------- wrapper ------------------------------------
def classification_cnn_forward(x, params, *, stride_conv, pad_h, pad_w, pool,
                               stride_pool, batch_block=128):
    """x: (N, C, H, W) float32. params: dict of PyTorch-convention weights."""
    wconv = params["conv1_w"]      # (F, C, KH, KW)
    bconv = params["conv1_b"]      # (F,)
    w1 = params["fc1_w"]           # (hidden, F*PH*PW)
    b1 = params["fc1_b"]           # (hidden,)
    w2 = params["fc2_w"]           # (num_classes, hidden)
    b2 = params["fc2_b"]           # (num_classes,)

    n, c, h, w = x.shape
    f, _, kh, kw = wconv.shape
    hidden = w1.shape[0]
    num_classes = w2.shape[0]

    assert stride_conv == 1 and pool == 2 and stride_pool == 2, (
        "kernel assumes stride_conv=1 and 2x2/stride-2 pooling (module defaults)")

    hp = h + 2 * pad_h
    wp = w + 2 * pad_w
    oh = hp - kh + 1
    ow = wp - kw + 1
    ph_out = (oh - pool) // stride_pool + 1
    pw_out = (ow - pool) // stride_pool + 1
    assert oh == 2 * ph_out and ow == 2 * pw_out
    assert w1.shape[1] == f * ph_out * pw_out

    cw = c * wp                    # conv matmul contraction dim
    half_cols = pw_out * f         # one w-pool slab of conv output columns
    ncols = 2 * half_cols
    n_even = (hp + 1) // 2         # number of even h rows after deinterleave

    # ---- input prep (glue): zero-pad, channel-major-of-width rows,
    # deinterleave rows (even h first, then odd h).  1x input bytes in HBM.
    xpad = jnp.pad(x.astype(jnp.float32),
                   ((0, 0), (0, 0), (pad_h, pad_h), (pad_w, pad_w)))
    xr = jnp.transpose(xpad, (0, 2, 1, 3)).reshape(n, hp, cw)   # (N, Hp, C*Wp)
    xr = jnp.concatenate([xr[:, 0::2, :], xr[:, 1::2, :]], axis=1)

    # Clamp the batch block to the 8-rounded batch, pad the batch.
    block = max(8, (min(batch_block, ((n + 7) // 8) * 8) // 8) * 8)
    n_pad = pl.cdiv(n, block) * block
    if n_pad != n:
        xr = jnp.pad(xr, ((0, n_pad - n), (0, 0), (0, 0)))

    # ---- banded conv weights (glue, built once, DMA'd on first step only) ----
    # wband[i, ci*Wp + wpi, dj*HC + pw*F + fi] = wconv[fi, ci, i, wpi - (2*pw+dj)]
    wc = wconv.astype(jnp.float32)
    wband = jnp.zeros((kh, cw, ncols), jnp.float32)
    for i in range(kh):
        for dj in range(2):
            for pw_i in range(pw_out):
                ow_i = 2 * pw_i + dj
                col0 = dj * half_cols + pw_i * f
                for j in range(kw):
                    wband = wband.at[i, (ow_i + j)::wp, col0:col0 + f].set(
                        wc[:, :, i, j].T)

    # Conv bias broadcast to the pooled (pw, f) lane layout.
    bcols = jnp.tile(bconv.astype(jnp.float32).reshape(1, f),
                     (pw_out, 1)).reshape(1, half_cols)

    # fc1 weight: permute columns from torch flatten order (f, ph, pw) to the
    # kernel's flat order (ph, pw, f), then transpose to (PH*PW*F, hidden).
    w1p = jnp.transpose(
        w1.astype(jnp.float32).reshape(hidden, f, ph_out, pw_out),
        (2, 3, 1, 0)).reshape(ph_out * pw_out * f, hidden)
    b1r = b1.reshape(1, hidden).astype(jnp.float32)

    # fc2: pad classes to a full 128-lane store.
    c_pad = max(128, ((num_classes + 127) // 128) * 128)
    w2tp = jnp.zeros((hidden, c_pad), jnp.float32)
    w2tp = w2tp.at[:, :num_classes].set(w2.T.astype(jnp.float32))
    b2p = jnp.zeros((1, c_pad), jnp.float32)
    b2p = b2p.at[:, :num_classes].set(b2.astype(jnp.float32))

    kernel = functools.partial(_cnn_kernel, kh=kh, ph_out=ph_out,
                               n_even=n_even, half_cols=half_cols)

    out = pl.pallas_call(
        kernel,
        out_shape=jax.ShapeDtypeStruct((n_pad, c_pad), jnp.float32),
        grid_spec=pltpu.PrefetchScalarGridSpec(
            num_scalar_prefetch=0,
            grid=(n_pad // block,),
            in_specs=[
                pl.BlockSpec((block, hp, cw), lambda b: (b, 0, 0)),
                pl.BlockSpec((kh, cw, ncols), lambda b: (0, 0, 0)),
                pl.BlockSpec((1, half_cols), lambda b: (0, 0)),
                pl.BlockSpec((ph_out * pw_out * f, hidden), lambda b: (0, 0)),
                pl.BlockSpec((1, hidden), lambda b: (0, 0)),
                pl.BlockSpec((hidden, c_pad), lambda b: (0, 0)),
                pl.BlockSpec((1, c_pad), lambda b: (0, 0)),
            ],
            out_specs=pl.BlockSpec((block, c_pad), lambda b: (b, 0)),
        ),
        compiler_params=pltpu.CompilerParams(
            dimension_semantics=("parallel",),
            # Per-block footprint is ~block * 12 KiB (padded raw image) plus
            # ~block * 5 KiB of accumulators; 32 MiB covers block=256 with 3x
            # headroom and is safe on v5e/v6e/v7x.
            vmem_limit_bytes=32 * 1024 * 1024),
    )(xr, wband, bcols, w1p, b1r, w2tp, b2p)

    return out[:n, :num_classes]


# ------------------------- pure-JAX reference -------------------------------
def reference_forward(x, params, *, stride_conv, pad_h, pad_w, pool,
                      stride_pool):
    wconv = params["conv1_w"]
    bconv = params["conv1_b"]
    conv = jax.lax.conv_general_dilated(
        x, wconv, (stride_conv, stride_conv),
        [(pad_h, pad_h), (pad_w, pad_w)],
        dimension_numbers=("NCHW", "OIHW", "NCHW"))
    conv = conv + bconv[None, :, None, None]
    pooled = jax.lax.reduce_window(conv, -jnp.inf, jax.lax.max,
                                   (1, 1, pool, pool),
                                   (1, 1, stride_pool, stride_pool), "VALID")
    act = jnp.maximum(pooled, 0.0)
    flat = act.reshape(x.shape[0], -1)
    h = jnp.maximum(flat @ params["fc1_w"].T + params["fc1_b"], 0.0)
    return h @ params["fc2_w"].T + params["fc2_b"]


# --------------------------------- main --------------------------------------
if __name__ == "__main__":
    # Small shapes consistent with the module (defaults scaled down).
    N = 18                              # not a multiple of 8: exercises padding
    C, H, W = 4, 16, 16                 # input_dim
    NUM_FILTERS = 8
    KERNEL_SIZE = 3
    STRIDE_CONV = 1
    WEIGHT_SCALE = 0.001
    POOL = 2
    STRIDE_POOL = 2
    HIDDEN_DIM = 32
    NUM_CLASSES = 10
    DROPOUT = 0.0                       # p=0 -> identity

    # "same" padding exactly as computed in the module's __init__.
    pad_h = int(((H - 1) * STRIDE_CONV - H + KERNEL_SIZE) / 2)
    pad_w = int(((W - 1) * STRIDE_CONV - W + KERNEL_SIZE) / 2)
    # fc1 fan-in via the module's own formula (pad_h == pad_w for this config).
    h_post = int((H + pad_h + pad_w - KERNEL_SIZE) / STRIDE_CONV) + 1
    w_post = int((W + pad_h + pad_w - KERNEL_SIZE) / STRIDE_CONV) + 1
    ph_out = int((h_post - POOL) / STRIDE_POOL) + 1
    pw_out = int((w_post - POOL) / STRIDE_POOL) + 1
    fc1_in = ph_out * pw_out * NUM_FILTERS

    key = jax.random.PRNGKey(0)
    kx, k1, k2, k3, k4, k5, k6 = jax.random.split(key, 7)

    x = jax.random.normal(kx, (N, C, H, W), dtype=jnp.float32)

    params = {
        # conv weights scaled by weight_scale, as in the module's __init__.
        "conv1_w": WEIGHT_SCALE * jax.random.normal(
            k1, (NUM_FILTERS, C, KERNEL_SIZE, KERNEL_SIZE), dtype=jnp.float32),
        "conv1_b": 0.01 * jax.random.normal(k2, (NUM_FILTERS,),
                                            dtype=jnp.float32),
        "fc1_w": 0.05 * jax.random.normal(k3, (HIDDEN_DIM, fc1_in),
                                          dtype=jnp.float32),
        "fc1_b": 0.01 * jax.random.normal(k4, (HIDDEN_DIM,),
                                          dtype=jnp.float32),
        "fc2_w": 0.05 * jax.random.normal(k5, (NUM_CLASSES, HIDDEN_DIM),
                                          dtype=jnp.float32),
        "fc2_b": 0.01 * jax.random.normal(k6, (NUM_CLASSES,),
                                          dtype=jnp.float32),
    }

    out = classification_cnn_forward(
        x, params, stride_conv=STRIDE_CONV, pad_h=pad_h, pad_w=pad_w,
        pool=POOL, stride_pool=STRIDE_POOL, batch_block=128)
    out = jax.block_until_ready(out)

    ref = reference_forward(x, params, stride_conv=STRIDE_CONV, pad_h=pad_h,
                            pad_w=pad_w, pool=POOL, stride_pool=STRIDE_POOL)
    ref = jax.block_until_ready(ref)

    assert out.shape == (N, NUM_CLASSES)
    assert jnp.allclose(out, ref, rtol=1e-4, atol=1e-5), (
        f"mismatch: max abs err {jnp.max(jnp.abs(out - ref))}")

    print("KERNEL_OK")
</pallas_src>

<mosaic_0001>
module attributes {stable_mosaic.version = 11 : i64} {
  func.func @_cnn_kernel(%arg0: i32, %arg1: memref<24x18x72xf32, #tpu.memory_space<vmem>>, %arg2: memref<3x72x128xf32, #tpu.memory_space<vmem>>, %arg3: memref<1x64xf32, #tpu.memory_space<vmem>>, %arg4: memref<512x32xf32, #tpu.memory_space<vmem>>, %arg5: memref<1x32xf32, #tpu.memory_space<vmem>>, %arg6: memref<32x128xf32, #tpu.memory_space<vmem>>, %arg7: memref<1x128xf32, #tpu.memory_space<vmem>>, %arg8: memref<24x128xf32, #tpu.memory_space<vmem>>) attributes {dimension_semantics = [#tpu.dimension_semantics<parallel>], iteration_bounds = array<i64: 1>, scalar_prefetch = 0 : i64, scratch_operands = 0 : i64, tpu.core_type = #tpu.core_type<tc>, window_params = [{transform_indices = @transform_0, window_bounds = array<i64: 24, 18, 72>}, {pipeline_mode = #tpu.pipeline_mode<synchronous>, transform_indices = @transform_1, window_bounds = array<i64: 3, 72, 128>}, {pipeline_mode = #tpu.pipeline_mode<synchronous>, transform_indices = @transform_2, window_bounds = array<i64: 1, 64>}, {pipeline_mode = #tpu.pipeline_mode<synchronous>, transform_indices = @transform_3, window_bounds = array<i64: 512, 32>}, {pipeline_mode = #tpu.pipeline_mode<synchronous>, transform_indices = @transform_4, window_bounds = array<i64: 1, 32>}, {pipeline_mode = #tpu.pipeline_mode<synchronous>, transform_indices = @transform_5, window_bounds = array<i64: 32, 128>}, {pipeline_mode = #tpu.pipeline_mode<synchronous>, transform_indices = @transform_6, window_bounds = array<i64: 1, 128>}, {transform_indices = @transform_7, window_bounds = array<i64: 24, 128>}]} {
    %c0 = arith.constant 0 : index
    %c0_0 = arith.constant 0 : index
    %c0_1 = arith.constant 0 : index
    %0 = vector.load %arg1[%c0, %c0_0, %c0_1] : memref<24x18x72xf32, #tpu.memory_space<vmem>>, vector<24x8x72xf32>
    %1 = vector.shape_cast %0 : vector<24x8x72xf32> to vector<192x72xf32>
    %c0_2 = arith.constant 0 : index
    %c0_3 = arith.constant 0 : index
    %c0_4 = arith.constant 0 : index
    %2 = vector.load %arg2[%c0_2, %c0_3, %c0_4] : memref<3x72x128xf32, #tpu.memory_space<vmem>>, vector<1x72x128xf32>
    %3 = vector.shape_cast %2 : vector<1x72x128xf32> to vector<72x128xf32>
    %cst = arith.constant dense<0.000000e+00> : vector<192x128xf32>
    %4 = tpu.matmul %1, %3, %cst {dimension_numbers = #tpu.dot_dimension_numbers<[1], [0], [0], [1], [0, 0, 1, 1], [], []>} : vector<192x72xf32>, vector<72x128xf32>, vector<192x128xf32> -> vector<192x128xf32>
    %c0_5 = arith.constant 0 : index
    %c9 = arith.constant 9 : index
    %c0_6 = arith.constant 0 : index
    %5 = vector.load %arg1[%c0_5, %c9, %c0_6] : memref<24x18x72xf32, #tpu.memory_space<vmem>>, vector<24x8x72xf32>
    %6 = vector.shape_cast %5 : vector<24x8x72xf32> to vector<192x72xf32>
    %c1 = arith.constant 1 : index
    %c0_7 = arith.constant 0 : index
    %c0_8 = arith.constant 0 : index
    %7 = vector.load %arg2[%c1, %c0_7, %c0_8] : memref<3x72x128xf32, #tpu.memory_space<vmem>>, vector<1x72x128xf32>
    %8 = vector.shape_cast %7 : vector<1x72x128xf32> to vector<72x128xf32>
    %cst_9 = arith.constant dense<0.000000e+00> : vector<192x128xf32>
    %9 = tpu.matmul %6, %8, %cst_9 {dimension_numbers = #tpu.dot_dimension_numbers<[1], [0], [0], [1], [0, 0, 1, 1], [], []>} : vector<192x72xf32>, vector<72x128xf32>, vector<192x128xf32> -> vector<192x128xf32>
    %10 = arith.addf %4, %9 : vector<192x128xf32>
    %c0_10 = arith.constant 0 : index
    %c0_11 = arith.constant 0 : index
    %c0_12 = arith.constant 0 : index
    %11 = vector.load %arg2[%c0_10, %c0_11, %c0_12] : memref<3x72x128xf32, #tpu.memory_space<vmem>>, vector<1x72x128xf32>
    %12 = vector.shape_cast %11 : vector<1x72x128xf32> to vector<72x128xf32>
    %cst_13 = arith.constant dense<0.000000e+00> : vector<192x128xf32>
    %13 = tpu.matmul %6, %12, %cst_13 {dimension_numbers = #tpu.dot_dimension_numbers<[1], [0], [0], [1], [0, 0, 1, 1], [], []>} : vector<192x72xf32>, vector<72x128xf32>, vector<192x128xf32> -> vector<192x128xf32>
    %c0_14 = arith.constant 0 : index
    %c1_15 = arith.constant 1 : index
    %c0_16 = arith.constant 0 : index
    %14 = vector.load %arg1[%c0_14, %c1_15, %c0_16] : memref<24x18x72xf32, #tpu.memory_space<vmem>>, vector<24x8x72xf32>
    %15 = vector.shape_cast %14 : vector<24x8x72xf32> to vector<192x72xf32>
    %c2 = arith.constant 2 : index
    %c0_17 = arith.constant 0 : index
    %c0_18 = arith.constant 0 : index
    %16 = vector.load %arg2[%c2, %c0_17, %c0_18] : memref<3x72x128xf32, #tpu.memory_space<vmem>>, vector<1x72x128xf32>
    %17 = vector.shape_cast %16 : vector<1x72x128xf32> to vector<72x128xf32>
    %cst_19 = arith.constant dense<0.000000e+00> : vector<192x128xf32>
    %18 = tpu.matmul %15, %17, %cst_19 {dimension_numbers = #tpu.dot_dimension_numbers<[1], [0], [0], [1], [0, 0, 1, 1], [], []>} : vector<192x72xf32>, vector<72x128xf32>, vector<192x128xf32> -> vector<192x128xf32>
    %19 = arith.addf %10, %18 : vector<192x128xf32>
    %c1_20 = arith.constant 1 : index
    %c0_21 = arith.constant 0 : index
    %c0_22 = arith.constant 0 : index
    %20 = vector.load %arg2[%c1_20, %c0_21, %c0_22] : memref<3x72x128xf32, #tpu.memory_space<vmem>>, vector<1x72x128xf32>
    %21 = vector.shape_cast %20 : vector<1x72x128xf32> to vector<72x128xf32>
    %cst_23 = arith.constant dense<0.000000e+00> : vector<192x128xf32>
    %22 = tpu.matmul %15, %21, %cst_23 {dimension_numbers = #tpu.dot_dimension_numbers<[1], [0], [0], [1], [0, 0, 1, 1], [], []>} : vector<192x72xf32>, vector<72x128xf32>, vector<192x128xf32> -> vector<192x128xf32>
    %23 = arith.addf %13, %22 : vector<192x128xf32>
    %c0_24 = arith.constant 0 : index
    %c10 = arith.constant 10 : index
    %c0_25 = arith.constant 0 : index
    %24 = vector.load %arg1[%c0_24, %c10, %c0_25] : memref<24x18x72xf32, #tpu.memory_space<vmem>>, vector<24x8x72xf32>
    %25 = vector.shape_cast %24 : vector<24x8x72xf32> to vector<192x72xf32>
    %c2_26 = arith.constant 2 : index
    %c0_27 = arith.constant 0 : index
    %c0_28 = arith.constant 0 : index
    %26 = vector.load %arg2[%c2_26, %c0_27, %c0_28] : memref<3x72x128xf32, #tpu.memory_space<vmem>>, vector<1x72x128xf32>
    %27 = vector.shape_cast %26 : vector<1x72x128xf32> to vector<72x128xf32>
    %cst_29 = arith.constant dense<0.000000e+00> : vector<192x128xf32>
    %28 = tpu.matmul %25, %27, %cst_29 {dimension_numbers = #tpu.dot_dimension_numbers<[1], [0], [0], [1], [0, 0, 1, 1], [], []>} : vector<192x72xf32>, vector<72x128xf32>, vector<192x128xf32> -> vector<192x128xf32>
    %29 = arith.addf %23, %28 : vector<192x128xf32>
    %30 = arith.maximumf %19, %29 : vector<192x128xf32>
    %31 = vector.shape_cast %30 : vector<192x128xf32> to vector<24x8x128xf32>
    %32 = vector.extract_strided_slice %31 {offsets = [0, 0, 0], sizes = [24, 8, 64], strides = [1, 1, 1]} : vector<24x8x128xf32> to vector<24x8x64xf32>
    %33 = vector.extract_strided_slice %31 {offsets = [0, 0, 64], sizes = [24, 8, 64], strides = [1, 1, 1]} : vector<24x8x128xf32> to vector<24x8x64xf32>
    %34 = arith.maximumf %32, %33 : vector<24x8x64xf32>
    %c0_30 = arith.constant 0 : index
    %c0_31 = arith.constant 0 : index
    %35 = vector.load %arg3[%c0_30, %c0_31] : memref<1x64xf32, #tpu.memory_space<vmem>>, vector<1x64xf32>
    %36 = vector.shape_cast %35 : vector<1x64xf32> to vector<1x1x64xf32>
    %37 = vector.broadcast %36 : vector<1x1x64xf32> to vector<24x8x64xf32>
    %38 = arith.addf %34, %37 : vector<24x8x64xf32>
    %cst_32 = arith.constant 0.000000e+00 : f32
    %39 = vector.broadcast %cst_32 : f32 to vector<24x8x64xf32>
    %40 = arith.maximumf %38, %39 : vector<24x8x64xf32>
    %41 = vector.shape_cast %40 : vector<24x8x64xf32> to vector<24x512xf32>
    %c0_33 = arith.constant 0 : index
    %c0_34 = arith.constant 0 : index
    %42 = vector.load %arg4[%c0_33, %c0_34] : memref<512x32xf32, #tpu.memory_space<vmem>>, vector<512x32xf32>
    %cst_35 = arith.constant dense<0.000000e+00> : vector<24x32xf32>
    %43 = tpu.matmul %41, %42, %cst_35 {dimension_numbers = #tpu.dot_dimension_numbers<[1], [0], [0], [1], [0, 0, 1, 1], [], []>} : vector<24x512xf32>, vector<512x32xf32>, vector<24x32xf32> -> vector<24x32xf32>
    %c0_36 = arith.constant 0 : index
    %c0_37 = arith.constant 0 : index
    %44 = vector.load %arg5[%c0_36, %c0_37] : memref<1x32xf32, #tpu.memory_space<vmem>>, vector<1x32xf32>
    %45 = vector.broadcast %44 : vector<1x32xf32> to vector<24x32xf32>
    %46 = arith.addf %43, %45 : vector<24x32xf32>
    %cst_38 = arith.constant 0.000000e+00 : f32
    %47 = vector.broadcast %cst_38 : f32 to vector<24x32xf32>
    %48 = arith.maximumf %46, %47 : vector<24x32xf32>
    %c0_39 = arith.constant 0 : index
    %c0_40 = arith.constant 0 : index
    %49 = vector.load %arg6[%c0_39, %c0_40] : memref<32x128xf32, #tpu.memory_space<vmem>>, vector<32x128xf32>
    %cst_41 = arith.constant dense<0.000000e+00> : vector<24x128xf32>
    %50 = tpu.matmul %48, %49, %cst_41 {dimension_numbers = #tpu.dot_dimension_numbers<[1], [0], [0], [1], [0, 0, 1, 1], [], []>} : vector<24x32xf32>, vector<32x128xf32>, vector<24x128xf32> -> vector<24x128xf32>
    %c0_42 = arith.constant 0 : index
    %c0_43 = arith.constant 0 : index
    %51 = vector.load %arg7[%c0_42, %c0_43] : memref<1x128xf32, #tpu.memory_space<vmem>>, vector<1x128xf32>
    %52 = vector.broadcast %51 : vector<1x128xf32> to vector<24x128xf32>
    %53 = arith.addf %50, %52 : vector<24x128xf32>
    %c0_44 = arith.constant 0 : index
    %c0_45 = arith.constant 0 : index
    %54 = vector.load %arg8[%c0_44, %c0_45] : memref<24x128xf32, #tpu.memory_space<vmem>>, vector<24x128xf32>
    tpu.vector_store %arg8[%c0_44, %c0_45], %53 {strides = array<i32>} : memref<24x128xf32, #tpu.memory_space<vmem>>, vector<24x128xf32>,
    return
  }
  func.func @transform_0(%arg0: i32) -> (i32, i32, i32) {
    %c0_i32 = arith.constant 0 : i32
    %c0_i32_0 = arith.constant 0 : i32
    %c0_i32_1 = arith.constant 0 : i32
    return %arg0, %c0_i32, %c0_i32_0 : i32, i32, i32
  }
  func.func @transform_1(%arg0: i32) -> (i32, i32, i32) {
    %c0_i32 = arith.constant 0 : i32
    %c0_i32_0 = arith.constant 0 : i32
    %c0_i32_1 = arith.constant 0 : i32
    %c0_i32_2 = arith.constant 0 : i32
    return %c0_i32, %c0_i32_0, %c0_i32_1 : i32, i32, i32
  }
  func.func @transform_2(%arg0: i32) -> (i32, i32) {
    %c0_i32 = arith.constant 0 : i32
    %c0_i32_0 = arith.constant 0 : i32
    %c0_i32_1 = arith.constant 0 : i32
    return %c0_i32, %c0_i32_0 : i32, i32
  }
  func.func @transform_3(%arg0: i32) -> (i32, i32) {
    %c0_i32 = arith.constant 0 : i32
    %c0_i32_0 = arith.constant 0 : i32
    %c0_i32_1 = arith.constant 0 : i32
    return %c0_i32, %c0_i32_0 : i32, i32
  }
  func.func @transform_4(%arg0: i32) -> (i32, i32) {
    %c0_i32 = arith.constant 0 : i32
    %c0_i32_0 = arith.constant 0 : i32
    %c0_i32_1 = arith.constant 0 : i32
    return %c0_i32, %c0_i32_0 : i32, i32
  }
  func.func @transform_5(%arg0: i32) -> (i32, i32) {
    %c0_i32 = arith.constant 0 : i32
    %c0_i32_0 = arith.constant 0 : i32
    %c0_i32_1 = arith.constant 0 : i32
    return %c0_i32, %c0_i32_0 : i32, i32
  }
  func.func @transform_6(%arg0: i32) -> (i32, i32) {
    %c0_i32 = arith.constant 0 : i32
    %c0_i32_0 = arith.constant 0 : i32
    %c0_i32_1 = arith.constant 0 : i32
    return %c0_i32, %c0_i32_0 : i32, i32
  }
  func.func @transform_7(%arg0: i32) -> (i32, i32) {
    %c0_i32 = arith.constant 0 : i32
    %c0_i32_0 = arith.constant 0 : i32
    return %arg0, %c0_i32 : i32, i32
  }
}

</mosaic_0001>

<bundles_post_ra>
// kernel: tpu_custom_call.1
= control target key start
LH: loop header
LB: loop body
LE: loop exit
PB: predicated region body
PF: predicated region fallthrough
CT: control target
= control target key end

     0   :  { %s3534_s0 = inlined_call_operand.vmem [shape: f32[24,18,72], index: 0, kind: input, shape index: {}]   ;;  %s3535_s1 = inlined_call_operand.vmem [shape: f32[3,72,128], index: 1, kind: input, shape index: {}]   ;;  %s3536_s2 = inlined_call_operand.vmem [shape: f32[1,64], index: 2, kind: input, shape index: {}]   ;;  %s3537_s3 = inlined_call_operand.vmem [shape: f32[512,32], index: 3, kind: input, shape index: {}]   ;;  %s3538_s4 = inlined_call_operand.vmem [shape: f32[1,32], index: 4, kind: input, shape index: {}]   ;;  %s3539_s5 = inlined_call_operand.vmem [shape: f32[32,128], index: 5, kind: input, shape index: {}]   ;;  %s3540_s6 = inlined_call_operand.vmem [shape: f32[1,128], index: 6, kind: input, shape index: {}]   ;;  %s3541_s7 = inlined_call_operand.hbm [shape: f32[24,128], index: 7, kind: output, shape index: {}]  }
   0x1   :  { %v2154_v0 = vld [vmem:[%s3535_s1 + $0x88] sm:$0xff]  ;;  %v59_v1 = vld [vmem:[%s3535_s1 + $0x40] sm:$0xff]  ;;  %v58_v3 = vld [vmem:[%s3535_s1 + $0x38] sm:$0xff] }
   0x2   :  { %v2162_v2 = vld [vmem:[%s3535_s1 + $0x80] sm:$0xff]  ;;  %174 = vmatpush.msra.mxu0 %v2154_v0  ;;  %335 = vmatpush.msra.mxu1 %v59_v1  ;;  %v2171_v4 = vld [vmem:[%s3535_s1 + $0x78] sm:$0xff]  ;;  %v2176_v5 = vld [vmem:[%s3535_s1 + $0x30] sm:$0xff] }
   0x3   :  { %2031 = vmatpush.msra.mxu2 %v59_v1  ;;  %2022 = vmatpush.msra.mxu3 %v2154_v0  ;;  %v2183_v6 = vld [vmem:[%s3535_s1 + $0x70] sm:$0xff]  ;;  %v2188_v7 = vld [vmem:[%s3535_s1 + $0x28] sm:$0xff]  ;;  %v2202_v9 = vld [vmem:[%s3535_s1 + $0x20] sm:$0xff] }
   0x4   :  { %175 = vmatpush.msra.mxu0 %v2162_v2  ;;  %336 = vmatpush.msra.mxu1 %v58_v3  ;;  %v2197_v8 = vld [vmem:[%s3535_s1 + $0x68] sm:$0xff]  ;;  %v2211_v10 = vld [vmem:[%s3535_s1 + $0x60] sm:$0xff]  ;;  %v2216_v11 = vld [vmem:[%s3535_s1 + $0x18] sm:$0xff] }
   0x5   :  { %2032 = vmatpush.msra.mxu2 %v58_v3  ;;  %2023 = vmatpush.msra.mxu3 %v2162_v2  ;;  %v2225_v12 = vld [vmem:[%s3535_s1 + $0x58] sm:$0xff]  ;;  %v2230_v13 = vld [vmem:[%s3535_s1 + $0x10] sm:$0xff]  ;;  %v2244_v15 = vld [vmem:[%s3535_s1 + $0x8] sm:$0xff] }
   0x6   :  { %176 = vmatpush.msra.mxu0 %v2171_v4  ;;  %337 = vmatpush.msra.mxu1 %v2176_v5  ;;  %v2239_v14 = vld [vmem:[%s3535_s1 + $0x50] sm:$0xff] }
   0x7   :  { %2033 = vmatpush.msra.mxu2 %v2176_v5  ;;  %2024 = vmatpush.msra.mxu3 %v2171_v4 }
   0x8   :  { %177 = vmatpush.msra.mxu0 %v2183_v6  ;;  %338 = vmatpush.msra.mxu1 %v2188_v7 }
   0x9   :  { %2034 = vmatpush.msra.mxu2 %v2188_v7  ;;  %2025 = vmatpush.msra.mxu3 %v2183_v6 }
   0xa   :  { %178 = vmatpush.msra.mxu0 %v2197_v8  ;;  %339 = vmatpush.msra.mxu1 %v2202_v9 }
   0xb   :  { %2035 = vmatpush.msra.mxu2 %v2202_v9  ;;  %2026 = vmatpush.msra.mxu3 %v2197_v8 }
   0xc   :  { %179 = vmatpush.msra.mxu0 %v2211_v10  ;;  %340 = vmatpush.msra.mxu1 %v2216_v11 }
   0xd   :  { %2036 = vmatpush.msra.mxu2 %v2216_v11  ;;  %2027 = vmatpush.msra.mxu3 %v2211_v10 }
   0xe   :  { %12 = vsyncpa [#allocation3], 0  ;;  %180 = vmatpush.msra.mxu0 %v2225_v12  ;;  %341 = vmatpush.msra.mxu1 %v2230_v13  ;;  %v2253_v16 = vld [vmem:[%s3535_s1 + $0x48] sm:$0xff]  ;;  %v2258_v17 = vld [vmem:[%s3535_s1] sm:$0xff]  ;;  %vm94_vm0 = vcmask 588800   ;;  %s2105_s19 = smov 64  }
   0xf   :  { %2037 = vmatpush.msra.mxu2 %v2230_v13  ;;  %2028 = vmatpush.msra.mxu3 %v2225_v12  ;;  %v2266_v18 = vld [vmem:[%s3534_s0 + $0x9] sm:$0xff]  ;;  %v27_v19 = vld [vmem:[%s3534_s0] sm:$0xff]  ;;  %v44_v20 = vld [vmem:[%s3534_s0 + $0x198] sm:$0xff]  ;;  %vm1220_vm1 = vcmask 1047556   ;;  %vm1604_vm2 = vcmask 523264   ;;  %vm1800_vm3 = vcmask 261120  }
  0x10   :  { %181 = vmatpush.msra.mxu0 %v2239_v14  ;;  %342 = vmatpush.msra.mxu1 %v2244_v15  ;;  %v1922_v21 = vld [vmem:[%s3535_s1 + $0xd0] sm:$0xff]  ;;  %v1921_v22 = vld [vmem:[%s3535_s1 + $0xc8] sm:$0xff]  ;;  %v1920_v23 = vld [vmem:[%s3535_s1 + $0xc0] sm:$0xff]  ;;  %s2108_s21 = smov [#allocation2]   ;;  %s1845_s25 = sshll.u32 %s3541_s7, 4  ;;  %s1846_s25 = int_to_ptr.hbm [resolvable:$true] %s1845_s25 }
  0x11   :  { %2038 = vmatpush.msra.mxu2 %v2244_v15  ;;  %2029 = vmatpush.msra.mxu3 %v2239_v14  ;;  %v2296_v24 = vld [vmem:[%s3534_s0 + $0x21] sm:$0xff]  ;;  %v28_v25 = vld [vmem:[%s3534_s0 + $0x18] sm:$0xff]  ;;  %v45_v26 = vld [vmem:[%s3534_s0 + $0x1b0] sm:$0xff]  ;;  %s1843_s22 = sshll.u32 %s2108_s21, 4  ;;  %s2110_s26 = smov 8   ;;  %s1844_s22 = int_to_ptr.vmem [resolvable:$true] %s1843_s22 }
  0x12   :  { %182 = vmatpush.msra.mxu0 %v2253_v16  ;;  %343 = vmatpush.msra.mxu1 %v2258_v17  ;;  %v1919_v27 = vld [vmem:[%s3535_s1 + $0xb8] sm:$0xff]  ;;  %v1918_v28 = vld [vmem:[%s3535_s1 + $0xb0] sm:$0xff]  ;;  %v46_v31 = vld [vmem:[%s3534_s0 + $0x1c8] sm:$0xff] }
  0x13   :  { %2039 = vmatpush.msra.mxu2 %v2258_v17  ;;  %1866 = vmatmul.msk.f32.vlgmr.msra.gmra.mxu0 %vm94_vm0, %v2266_v18  ;;  %v2323_v29 = vld [vmem:[%s3534_s0 + $0x39] sm:$0xff]  ;;  %v29_v30 = vld [vmem:[%s3534_s0 + $0x30] sm:$0xff]  ;;  %v1917_v32 = vld [vmem:[%s3535_s1 + $0xa8] sm:$0xff] }
  0x14   :  { %1890 = vmatmul.msk.f32.vlgmr.msra.gmra.mxu1 %vm94_vm0, %v27_v19  ;;  %1907 = vmatmul.msk.f32.vlgmr.msra.gmra.mxu2 %vm94_vm0, %v44_v20  ;;  %v1916_v33 = vld [vmem:[%s3535_s1 + $0xa0] sm:$0xff]  ;;  %v1915_v34 = vld [vmem:[%s3535_s1 + $0x98] sm:$0xff]  ;;  %v1914_v36 = vld [vmem:[%s3535_s1 + $0x90] sm:$0xff] }
  0x15   :  { %732 = vmatpush.msrb.mxu0 %v59_v1  ;;  %917 = vmatpush.msrb.mxu1 %v1922_v21  ;;  %v2352_v35 = vld [vmem:[%s3534_s0 + $0x51] sm:$0xff]  ;;  %v30_v37 = vld [vmem:[%s3534_s0 + $0x48] sm:$0xff]  ;;  %v47_v38 = vld [vmem:[%s3534_s0 + $0x1e0] sm:$0xff] }
  0x16   :  { %530 = vmatpush.msrb.mxu2 %v1922_v21  ;;  %2030 = vmatpush.msra.mxu3 %v2253_v16  ;;  %v2375_v39 = vld [vmem:[%s3534_s0 + $0x69] sm:$0xff]  ;;  %v31_v40 = vld [vmem:[%s3534_s0 + $0x60] sm:$0xff]  ;;  %v48_v41 = vld [vmem:[%s3534_s0 + $0x1f8] sm:$0xff] }
  0x17   :  { %733 = vmatpush.msrb.mxu0 %v58_v3  ;;  %918 = vmatpush.msrb.mxu1 %v1921_v22  ;;  %v2390_v42 = vld [vmem:[%s3534_s0 + $0x81] sm:$0xff]  ;;  %v32_v43 = vld [vmem:[%s3534_s0 + $0x78] sm:$0xff]  ;;  %v49_v44 = vld [vmem:[%s3534_s0 + $0x210] sm:$0xff] }
  0x18   :  { %531 = vmatpush.msrb.mxu2 %v1921_v22  ;;  %643 = vmatpush.msrb.mxu3 %v2154_v0  ;;  %v2405_v45 = vld [vmem:[%s3534_s0 + $0x1a1] sm:$0xff]  ;;  %v2412_v46 = vld [vmem:[%s3534_s0 + $0x99] sm:$0xff]  ;;  %v33_v47 = vld [vmem:[%s3534_s0 + $0x90] sm:$0xff] }
  0x19   :  { %734 = vmatpush.msrb.mxu0 %v2176_v5  ;;  %919 = vmatpush.msrb.mxu1 %v1920_v23  ;;  %v50_v48 = vld [vmem:[%s3534_s0 + $0x228] sm:$0xff]  ;;  %v2427_v49 = vld [vmem:[%s3534_s0 + $0x1b9] sm:$0xff]  ;;  %v2434_v50 = vld [vmem:[%s3534_s0 + $0xb1] sm:$0xff] }
  0x1a   :  { %532 = vmatpush.msrb.mxu2 %v1920_v23  ;;  %644 = vmatpush.msrb.mxu3 %v2162_v2  ;;  %v34_v51 = vld [vmem:[%s3534_s0 + $0xa8] sm:$0xff]  ;;  %v2449_v53 = vld [vmem:[%s3534_s0 + $0x1d1] sm:$0xff]  ;;  %v35_v55 = vld [vmem:[%s3534_s0 + $0xc0] sm:$0xff] }
  0x1b   :  { %1867 = vmatmul.msk.f32.gmra.mxu0 %vm94_vm0, %v2296_v24  ;;  %920 = vmatpush.msrb.mxu1 %v1919_v27  ;;  %v417_v52 = vld [vmem:[%s3534_s0 + $0x1] sm:$0xff]  ;;  %v2456_v54 = vld [vmem:[%s3534_s0 + $0xc9] sm:$0xff]  ;;  %v418_v56 = vld [vmem:[%s3534_s0 + $0x19] sm:$0xff] }
  0x1c   :  { %1891 = vmatmul.msk.f32.gmra.mxu1 %vm94_vm0, %v28_v25  ;;  %1908 = vmatmul.msk.f32.gmra.mxu2 %vm94_vm0, %v45_v26  ;;  %v2471_v57 = vld [vmem:[%s3534_s0 + $0x1e9] sm:$0xff]  ;;  %v2478_v58 = vld [vmem:[%s3534_s0 + $0xe1] sm:$0xff]  ;;  %v36_v59 = vld [vmem:[%s3534_s0 + $0xd8] sm:$0xff] }
  0x1d   :  { %533 = vmatpush.msrb.mxu2 %v1919_v27  ;;  %735 = vmatpush.msrb.mxu0 %v2188_v7  ;;  %v419_v60 = vld [vmem:[%s3534_s0 + $0x31] sm:$0xff]  ;;  %v2493_v61 = vld [vmem:[%s3534_s0 + $0x201] sm:$0xff]  ;;  %v2500_v62 = vld [vmem:[%s3534_s0 + $0xf9] sm:$0xff] }
  0x1e   :  { %645 = vmatpush.msrb.mxu3 %v2171_v4  ;;  %921 = vmatpush.msrb.mxu1 %v1918_v28  ;;  %v37_v63 = vld [vmem:[%s3534_s0 + $0xf0] sm:$0xff]  ;;  %v2515_v1 = vld [vmem:[%s3534_s0 + $0x219] sm:$0xff]  ;;  %v38_v3 = vld [vmem:[%s3534_s0 + $0x108] sm:$0xff] }
  0x1f   :  { %534 = vmatpush.msrb.mxu2 %v1918_v28  ;;  %736 = vmatpush.msrb.mxu0 %v2202_v9  ;;  %v420_v0 = vld [vmem:[%s3534_s0 + $0x49] sm:$0xff]  ;;  %v2522_v2 = vld [vmem:[%s3534_s0 + $0x111] sm:$0xff]  ;;  %v421_v4 = vld [vmem:[%s3534_s0 + $0x61] sm:$0xff] }
  0x20   :  { %646 = vmatpush.msrb.mxu3 %v2183_v6  ;;  %922 = vmatpush.msrb.mxu1 %v1917_v32  ;;  %v2537_v5 = vld [vmem:[%s3534_s0 + $0x231] sm:$0xff]  ;;  %v2544_v6 = vld [vmem:[%s3534_s0 + $0x129] sm:$0xff]  ;;  %v39_v7 = vld [vmem:[%s3534_s0 + $0x120] sm:$0xff] }
  0x21   :  { %737 = vmatpush.msrb.mxu0 %v2216_v11  ;;  %535 = vmatpush.msrb.mxu2 %v1917_v32  ;;  %v2560_v9 = vld [vmem:[%s3534_s0 + $0x141] sm:$0xff]  ;;  %v423_v11 = vld [vmem:[%s3534_s0 + $0x91] sm:$0xff]  ;;  %v2610_v20 = vld [vmem:[%s3534_s0 + $0x189] sm:$0xff] }
  0x22   :  { %647 = vmatpush.msrb.mxu3 %v2197_v8  ;;  %923 = vmatpush.msrb.mxu1 %v1916_v33  ;;  %v422_v8 = vld [vmem:[%s3534_s0 + $0x79] sm:$0xff]  ;;  %v427_v27 = vld [vmem:[%s3534_s0 + $0xf1] sm:$0xff] }
  0x23   :  { %1868 = vmatmul.msk.f32.gmra.mxu0 %vm94_vm0, %v2323_v29  ;;  %536 = vmatpush.msrb.mxu2 %v1916_v33  ;;  %v43_v22 = vld [vmem:[%s3534_s0 + $0x180] sm:$0xff]  ;;  %v814_v28 = vld [vmem:[%s3534_s0 + $0xa] sm:$0xff] }
  0x24   :  { %1892 = vmatmul.msk.f32.gmra.mxu1 %vm94_vm0, %v29_v30  ;;  %1909 = vmatmul.msk.f32.gmra.mxu2 %vm94_vm0, %v46_v31  ;;  %v426_v23 = vld [vmem:[%s3534_s0 + $0xd9] sm:$0xff]  ;;  %v428_v33 = vld [vmem:[%s3534_s0 + $0x109] sm:$0xff] }
  0x25   :  { %738 = vmatpush.msrb.mxu0 %v2230_v13  ;;  %648 = vmatpush.msrb.mxu3 %v2211_v10  ;;  %v40_v10 = vld [vmem:[%s3534_s0 + $0x138] sm:$0xff]  ;;  %v41_v13 = vld [vmem:[%s3534_s0 + $0x150] sm:$0xff] }
  0x26   :  { %537 = vmatpush.msrb.mxu2 %v1915_v34  ;;  %924 = vmatpush.msrb.mxu1 %v1915_v34  ;;  %v815_v34 = vld [vmem:[%s3534_s0 + $0x22] sm:$0xff] }
  0x27   :  { %739 = vmatpush.msrb.mxu0 %v2244_v15  ;;  %649 = vmatpush.msrb.mxu3 %v2225_v12  ;;  %v2576_v12 = vld [vmem:[%s3534_s0 + $0x159] sm:$0xff]  ;;  %v2592_v15 = vld [vmem:[%s3534_s0 + $0x171] sm:$0xff] }
  0x28   :  { %538 = vmatpush.msrb.mxu2 %v1914_v36  ;;  %925 = vmatpush.msrb.mxu1 %v1914_v36 }
  0x29   :  { %650 = vmatpush.msrb.mxu3 %v2239_v14  ;;  %740 = vmatpush.msrb.mxu0 %v2258_v17  ;;  %v424_v14 = vld [vmem:[%s3534_s0 + $0xa9] sm:$0xff]  ;;  %v425_v17 = vld [vmem:[%s3534_s0 + $0xc1] sm:$0xff] }
  0x2a   :  { %1883 = vmatmul.msk.f32.vlgmr.msra.gmra.mxu3 %vm94_vm0, %v2405_v45 }
  0x2b   :  { %1869 = vmatmul.msk.f32.gmra.mxu0 %vm94_vm0, %v2352_v35  ;;  %651 = vmatpush.msrb.mxu3 %v2253_v16  ;;  %v42_v16 = vld [vmem:[%s3534_s0 + $0x168] sm:$0xff] }
  0x2c   :  { %1893 = vmatmul.msk.f32.gmra.mxu1 %vm94_vm0, %v30_v37  ;;  %1910 = vmatmul.msk.f32.gmra.mxu2 %vm94_vm0, %v47_v38  ;;  %v429_v38 = vld [vmem:[%s3534_s0 + $0x121] sm:$0xff] }
  0x32   :  { %1884 = vmatmul.msk.f32.gmra.mxu3 %vm94_vm0, %v2427_v49 }
  0x33   :  { %1870 = vmatmul.msk.f32.gmra.mxu0 %vm94_vm0, %v2375_v39 }
  0x34   :  { %1894 = vmatmul.msk.f32.gmra.mxu1 %vm94_vm0, %v31_v40  ;;  %1911 = vmatmul.msk.f32.gmra.mxu2 %vm94_vm0, %v48_v41  ;;  %v816_v40 = vld [vmem:[%s3534_s0 + $0x3a] sm:$0xff] }
  0x3a   :  { %1885 = vmatmul.msk.f32.gmra.mxu3 %vm94_vm0, %v2449_v53 }
  0x3b   :  { %1871 = vmatmul.msk.f32.gmra.mxu0 %vm94_vm0, %v2390_v42 }
  0x3c   :  { %1895 = vmatmul.msk.f32.gmra.mxu1 %vm94_vm0, %v32_v43  ;;  %1912 = vmatmul.msk.f32.gmra.mxu2 %vm94_vm0, %v49_v44  ;;  %v430_v43 = vld [vmem:[%s3534_s0 + $0x139] sm:$0xff] }
  0x3d   :  { %v817_v44 = vld [vmem:[%s3534_s0 + $0x52] sm:$0xff] }
  0x42   :  { %1886 = vmatmul.msk.f32.gmra.mxu3 %vm94_vm0, %v2471_v57 }
  0x43   :  { %1872 = vmatmul.msk.f32.gmra.mxu0 %vm94_vm0, %v2412_v46 }
  0x44   :  { %1896 = vmatmul.msk.f32.gmra.mxu1 %vm94_vm0, %v33_v47  ;;  %1913 = vmatmul.msk.f32.gmra.mxu2 %vm94_vm0, %v50_v48 }
  0x4a   :  { %1887 = vmatmul.msk.f32.gmra.mxu3 %vm94_vm0, %v2493_v61 }
  0x4b   :  { %1873 = vmatmul.msk.f32.gmra.mxu0 %vm94_vm0, %v2434_v50 }
  0x4c   :  { %1897 = vmatmul.msk.f32.gmra.mxu1 %vm94_vm0, %v34_v51  ;;  %1923 = vmatmul.msk.f32.vlgmr.msrb.gmra.mxu2 %vm94_vm0, %v417_v52  ;;  %v431_v51 = vld [vmem:[%s3534_s0 + $0x151] sm:$0xff] }
  0x52   :  { %1888 = vmatmul.msk.f32.gmra.mxu3 %vm94_vm0, %v2515_v1 }
  0x53   :  { %1874 = vmatmul.msk.f32.gmra.mxu0 %vm94_vm0, %v2456_v54 }
  0x54   :  { %1898 = vmatmul.msk.f32.gmra.mxu1 %vm94_vm0, %v35_v55  ;;  %1924 = vmatmul.msk.f32.gmra.mxu2 %vm94_vm0, %v418_v56 }
  0x5a   :  { %1889 = vmatmul.msk.f32.gmra.mxu3 %vm94_vm0, %v2537_v5 }
  0x5b   :  { %1875 = vmatmul.msk.f32.gmra.mxu0 %vm94_vm0, %v2478_v58 }
  0x5c   :  { %1899 = vmatmul.msk.f32.gmra.mxu1 %vm94_vm0, %v36_v59  ;;  %1925 = vmatmul.msk.f32.gmra.mxu2 %vm94_vm0, %v419_v60 }
  0x62   :  { %1947 = vmatmul.msk.f32.vlgmr.msrb.gmra.mxu3 %vm94_vm0, %v417_v52  ;;  %v818_v52 = vld [vmem:[%s3534_s0 + $0x6a] sm:$0xff] }
  0x63   :  { %1876 = vmatmul.msk.f32.gmra.mxu0 %vm94_vm0, %v2500_v62 }
  0x64   :  { %1900 = vmatmul.msk.f32.gmra.mxu1 %vm94_vm0, %v37_v63  ;;  %1926 = vmatmul.msk.f32.gmra.mxu2 %vm94_vm0, %v420_v0 }
  0x6a   :  { %1948 = vmatmul.msk.f32.gmra.mxu3 %vm94_vm0, %v418_v56 }
  0x6b   :  { %1877 = vmatmul.msk.f32.gmra.mxu0 %vm94_vm0, %v2522_v2 }
  0x6c   :  { %1901 = vmatmul.msk.f32.gmra.mxu1 %vm94_vm0, %v38_v3  ;;  %1927 = vmatmul.msk.f32.gmra.mxu2 %vm94_vm0, %v421_v4 }
  0x72   :  { %1949 = vmatmul.msk.f32.gmra.mxu3 %vm94_vm0, %v419_v60  ;;  %v432_v60 = vld [vmem:[%s3534_s0 + $0x169] sm:$0xff] }
  0x73   :  { %1878 = vmatmul.msk.f32.gmra.mxu0 %vm94_vm0, %v2544_v6 }
  0x74   :  { %1902 = vmatmul.msk.f32.gmra.mxu1 %vm94_vm0, %v39_v7  ;;  %1928 = vmatmul.msk.f32.gmra.mxu2 %vm94_vm0, %v422_v8 }
  0x7a   :  { %1950 = vmatmul.msk.f32.gmra.mxu3 %vm94_vm0, %v420_v0 }
  0x7b   :  { %1879 = vmatmul.msk.f32.gmra.mxu0 %vm94_vm0, %v2560_v9 }
  0x7c   :  { %1903 = vmatmul.msk.f32.gmra.mxu1 %vm94_vm0, %v40_v10  ;;  %1929 = vmatmul.msk.f32.gmra.mxu2 %vm94_vm0, %v423_v11 }
  0x82   :  { %1951 = vmatmul.msk.f32.gmra.mxu3 %vm94_vm0, %v421_v4 }
  0x83   :  { %1880 = vmatmul.msk.f32.gmra.mxu0 %vm94_vm0, %v2576_v12 }
  0x84   :  { %1904 = vmatmul.msk.f32.gmra.mxu1 %vm94_vm0, %v41_v13  ;;  %1930 = vmatmul.msk.f32.gmra.mxu2 %vm94_vm0, %v424_v14 }
  0x8a   :  { %1952 = vmatmul.msk.f32.gmra.mxu3 %vm94_vm0, %v422_v8  ;;  %v433_v8 = vld [vmem:[%s3534_s0 + $0x181] sm:$0xff] }
  0x8b   :  { %1881 = vmatmul.msk.f32.gmra.mxu0 %vm94_vm0, %v2592_v15 }
  0x8c   :  { %1905 = vmatmul.msk.f32.gmra.mxu1 %vm94_vm0, %v42_v16  ;;  %1931 = vmatmul.msk.f32.gmra.mxu2 %vm94_vm0, %v425_v17 }
  0x90   :  { %v2605_v19 = vpop.f32.mrf.mxu0 }
  0x91   :  { %v2612_v21 = vpop.f32.mrf.mxu1 }
  0x92   :  { %1953 = vmatmul.msk.f32.gmra.mxu3 %vm94_vm0, %v423_v11 }
  0x93   :  { %1882 = vmatmul.msk.f32.gmra.mxu0 %vm94_vm0, %v2610_v20 }
  0x94   :  { %1906 = vmatmul.msk.f32.gmra.mxu1 %vm94_vm0, %v43_v22  ;;  %1932 = vmatmul.msk.f32.gmra.mxu2 %vm94_vm0, %v426_v23 }
  0x97   :  { %v396_v30 = vpop.f32.mrf.mxu2 }
  0x98   :  { %v2625_v25 = vpop.f32.mrf.mxu0 }
  0x99   :  { %v2627_v26 = vpop.f32.mrf.mxu1 }
  0x9a   :  { %1954 = vmatmul.msk.f32.gmra.mxu3 %vm94_vm0, %v424_v14 }
  0x9b   :  { %1971 = vmatmul.msk.f32.vlgmr.msrb.gmra.mxu0 %vm94_vm0, %v2266_v18 }
  0x9c   :  { %1933 = vmatmul.msk.f32.gmra.mxu2 %vm94_vm0, %v427_v27  ;;  %1995 = vmatmul.msk.f32.vlgmr.msrb.gmra.mxu1 %vm94_vm0, %v814_v28 }
  0x9f   :  { %v399_v36 = vpop.f32.mrf.mxu2 }
  0xa0   :  { %v2640_v31 = vpop.f32.mrf.mxu0 }
  0xa1   :  { %v2642_v32 = vpop.f32.mrf.mxu1 }
  0xa2   :  { %1955 = vmatmul.msk.f32.gmra.mxu3 %vm94_vm0, %v425_v17  ;;  %v434_v17 = vld [vmem:[%s3534_s0 + $0x199] sm:$0xff] }
  0xa3   :  { %1972 = vmatmul.msk.f32.gmra.mxu0 %vm94_vm0, %v2296_v24 }
  0xa4   :  { %1934 = vmatmul.msk.f32.gmra.mxu2 %vm94_vm0, %v428_v33  ;;  %1996 = vmatmul.msk.f32.gmra.mxu1 %vm94_vm0, %v815_v34 }
  0xa7   :  { %v402_v47 = vpop.f32.mrf.mxu2 }
  0xa8   :  { %v2655_v18 = vpop.f32.mrf.mxu0 }
  0xa9   :  { %v2657_v37 = vpop.f32.mrf.mxu1 }
  0xaa   :  { %1956 = vmatmul.msk.f32.gmra.mxu3 %vm94_vm0, %v426_v23 }
  0xab   :  { %1973 = vmatmul.msk.f32.gmra.mxu0 %vm94_vm0, %v2323_v29 }
  0xac   :  { %1935 = vmatmul.msk.f32.gmra.mxu2 %vm94_vm0, %v429_v38  ;;  %1997 = vmatmul.msk.f32.gmra.mxu1 %vm94_vm0, %v816_v40 }
  0xad   :  { %v235_v56 = vpop.f32.mrf.mxu3 }
  0xae   :  { %v2710_v63 = vadd.f32 %v396_v30, %v235_v56  ;;  %v435_v30 = vld [vmem:[%s3534_s0 + $0x1b1] sm:$0xff] }
  0xb0   :  { %v2670_v24 = vpop.f32.mrf.mxu0  ;;  %3542 = vst [vmem:[#allocation5_spill] sm:$0xff] %v2710_v63  ;;  %v830_v63 = vld [vmem:[%s3534_s0 + $0x18a] sm:$0xff] }
  0xb1   :  { %v2672_v41 = vpop.f32.mrf.mxu1 }
  0xb2   :  { %1957 = vmatmul.msk.f32.gmra.mxu3 %vm94_vm0, %v427_v27 }
  0xb3   :  { %1974 = vmatmul.msk.f32.gmra.mxu0 %vm94_vm0, %v2352_v35  ;;  %v405_v35 = vpop.f32.mrf.mxu2 }
  0xb4   :  { %1936 = vmatmul.msk.f32.gmra.mxu2 %vm94_vm0, %v430_v43  ;;  %1998 = vmatmul.msk.f32.gmra.mxu1 %vm94_vm0, %v817_v44  ;;  %v436_v44 = vld [vmem:[%s3534_s0 + $0x1c9] sm:$0xff] }
  0xb5   :  { %v238_v4 = vpop.f32.mrf.mxu3 }
  0xb6   :  { %v2727_v10 = vadd.f32 %v399_v36, %v238_v4 }
  0xb8   :  { %v2685_v29 = vpop.f32.mrf.mxu0  ;;  %3543 = vst [vmem:[#allocation6_spill] sm:$0xff] %v2727_v10 }
  0xb9   :  { %v2687_v48 = vpop.f32.mrf.mxu1 }
  0xba   :  { %1958 = vmatmul.msk.f32.gmra.mxu3 %vm94_vm0, %v428_v33  ;;  %v822_v33 = vld [vmem:[%s3534_s0 + $0xca] sm:$0xff] }
  0xbb   :  { %1975 = vmatmul.msk.f32.gmra.mxu0 %vm94_vm0, %v2375_v39  ;;  %v819_v39 = vld [vmem:[%s3534_s0 + $0x82] sm:$0xff]  ;;  %v408_v0 = vpop.f32.mrf.mxu2 }
  0xbc   :  { %1937 = vmatmul.msk.f32.gmra.mxu2 %vm94_vm0, %v431_v51  ;;  %1999 = vmatmul.msk.f32.gmra.mxu1 %vm94_vm0, %v818_v52 }
  0xbd   :  { %v241_v13 = vpop.f32.mrf.mxu3 }
  0xbe   :  { %v2744_v22 = vadd.f32 %v402_v47, %v241_v13  ;;  %v823_v47 = vld [vmem:[%s3534_s0 + $0xe2] sm:$0xff] }
  0xc0   :  { %v2700_v55 = vpop.f32.mrf.mxu0  ;;  %3544 = vst [vmem:[#allocation7_spill] sm:$0xff] %v2744_v22 }
  0xc1   :  { %v2702_v59 = vpop.f32.mrf.mxu1 }
  0xc2   :  { %1959 = vmatmul.msk.f32.gmra.mxu3 %vm94_vm0, %v429_v38 }
  0xc3   :  { %1976 = vmatmul.msk.f32.gmra.mxu0 %vm94_vm0, %v2390_v42  ;;  %v820_v42 = vld [vmem:[%s3534_s0 + $0x9a] sm:$0xff]  ;;  %v411_v14 = vpop.f32.mrf.mxu2 }
  0xc4   :  { %1938 = vmatmul.msk.f32.gmra.mxu2 %vm94_vm0, %v432_v60  ;;  %2000 = vmatmul.msk.f32.gmra.mxu1 %vm94_vm0, %v819_v39  ;;  %v437_v39 = vld [vmem:[%s3534_s0 + $0x1e1] sm:$0xff] }
  0xc5   :  { %v244_v27 = vpop.f32.mrf.mxu3 }
  0xc8   :  { %v2717_v3 = vpop.f32.mrf.mxu0 }
  0xc9   :  { %v2719_v7 = vpop.f32.mrf.mxu1 }
  0xca   :  { %1960 = vmatmul.msk.f32.gmra.mxu3 %vm94_vm0, %v430_v43 }
  0xcb   :  { %1977 = vmatmul.msk.f32.gmra.mxu0 %vm94_vm0, %v2412_v46  ;;  %v821_v46 = vld [vmem:[%s3534_s0 + $0xb2] sm:$0xff]  ;;  %v414_v34 = vpop.f32.mrf.mxu2 }
  0xcc   :  { %1939 = vmatmul.msk.f32.gmra.mxu2 %vm94_vm0, %v433_v8  ;;  %2001 = vmatmul.msk.f32.gmra.mxu1 %vm94_vm0, %v820_v42 }
  0xcd   :  { %v247_v38 = vpop.f32.mrf.mxu3 }
  0xd0   :  { %v2734_v11 = vpop.f32.mrf.mxu0 }
  0xd1   :  { %v2736_v16 = vpop.f32.mrf.mxu1 }
  0xd2   :  { %1961 = vmatmul.msk.f32.gmra.mxu3 %vm94_vm0, %v431_v51 }
  0xd3   :  { %1978 = vmatmul.msk.f32.gmra.mxu0 %vm94_vm0, %v2434_v50  ;;  %v2761_v50 = vadd.f32 %v405_v35, %v244_v27  ;;  %v2784_v43 = vpop.f32.mrf.mxu2 }
  0xd4   :  { %1940 = vmatmul.msk.f32.gmra.mxu2 %vm94_vm0, %v434_v17  ;;  %2002 = vmatmul.msk.f32.gmra.mxu1 %vm94_vm0, %v821_v46 }
  0xd5   :  { %3545 = vst [vmem:[#allocation8_spill] sm:$0xff] %v2761_v50  ;;  %v250_v35 = vpop.f32.mrf.mxu3  ;;  %v346_v50 = vadd.f32 %v2612_v21, %v2605_v19 }
  0xd8   :  { %v2751_v23 = vpop.f32.mrf.mxu0 }
  0xd9   :  { %v2753_v28 = vpop.f32.mrf.mxu1 }
  0xda   :  { %1962 = vmatmul.msk.f32.gmra.mxu3 %vm94_vm0, %v432_v60 }
  0xdb   :  { %1979 = vmatmul.msk.f32.gmra.mxu0 %vm94_vm0, %v2456_v54  ;;  %v2778_v54 = vadd.f32 %v408_v0, %v247_v38  ;;  %v2797_v0 = vadd.f32 %v411_v14, %v250_v35  ;;  %v2804_v51 = vpop.f32.mrf.mxu2  ;;  %v438_v14 = vld [vmem:[%s3534_s0 + $0x1f9] sm:$0xff] }
  0xdc   :  { %1941 = vmatmul.msk.f32.gmra.mxu2 %vm94_vm0, %v435_v30  ;;  %2003 = vmatmul.msk.f32.gmra.mxu1 %vm94_vm0, %v822_v33 }
  0xdd   :  { %3546 = vst [vmem:[#allocation9_spill] sm:$0xff] %v2778_v54  ;;  %v253_v42 = vpop.f32.mrf.mxu3  ;;  %v829_v54 = vld [vmem:[%s3534_s0 + $0x172] sm:$0xff] }
  0xde   :  { %3547 = vst [vmem:[#allocation10_spill] sm:$0xff] %v2797_v0  ;;  %v2816_v46 = vadd.f32 %v414_v34, %v253_v42  ;;  %v439_v34 = vld [vmem:[%s3534_s0 + $0x211] sm:$0xff]  ;;  %v828_v0 = vld [vmem:[%s3534_s0 + $0x15a] sm:$0xff] }
  0xe0   :  { %v2768_v36 = vpop.f32.mrf.mxu0  ;;  %3548 = vst [vmem:[#allocation11_spill] sm:$0xff] %v2816_v46 }
  0xe1   :  { %v2770_v40 = vpop.f32.mrf.mxu1 }
  0xe2   :  { %1963 = vmatmul.msk.f32.gmra.mxu3 %vm94_vm0, %v433_v8 }
  0xe3   :  { %1980 = vmatmul.msk.f32.gmra.mxu0 %vm94_vm0, %v2478_v58  ;;  %v824_v58 = vld [vmem:[%s3534_s0 + $0xfa] sm:$0xff]  ;;  %v2825_v33 = vpop.f32.mrf.mxu2 }
  0xe4   :  { %1942 = vmatmul.msk.f32.gmra.mxu2 %vm94_vm0, %v436_v44  ;;  %2004 = vmatmul.msk.f32.gmra.mxu1 %vm94_vm0, %v823_v47 }
  0xe5   :  { %v653_v27 = vpop.f32.mrf.mxu3 }
  0xe8   :  { %v2787_v52 = vpop.f32.mrf.mxu0 }
  0xe9   :  { %v2789_v56 = vpop.f32.mrf.mxu1 }
  0xea   :  { %1964 = vmatmul.msk.f32.gmra.mxu3 %vm94_vm0, %v434_v17 }
  0xeb   :  { %1981 = vmatmul.msk.f32.gmra.mxu0 %vm94_vm0, %v2500_v62  ;;  %v825_v62 = vld [vmem:[%s3534_s0 + $0x112] sm:$0xff]  ;;  %v2852_v42 = vpop.f32.mrf.mxu2 }
  0xec   :  { %1943 = vmatmul.msk.f32.gmra.mxu2 %vm94_vm0, %v437_v39  ;;  %2005 = vmatmul.msk.f32.gmra.mxu1 %vm94_vm0, %v824_v58  ;;  %v2847_v58 = vld [vmem:[%s3534_s0 + $0x229] sm:$0xff] }
  0xed   :  { %v656_v47 = vpop.f32.mrf.mxu3 }
  0xf0   :  { %v2806_v4 = vpop.f32.mrf.mxu0 }
  0xf1   :  { %v2808_v13 = vpop.f32.mrf.mxu1 }
  0xf2   :  { %1965 = vmatmul.msk.f32.gmra.mxu3 %vm94_vm0, %v435_v30 }
  0xf3   :  { %1982 = vmatmul.msk.f32.gmra.mxu0 %vm94_vm0, %v2522_v2  ;;  %v826_v2 = vld [vmem:[%s3534_s0 + $0x12a] sm:$0xff] }
  0xf4   :  { %1944 = vmatmul.msk.f32.gmra.mxu2 %vm94_vm0, %v438_v14  ;;  %2006 = vmatmul.msk.f32.gmra.mxu1 %vm94_vm0, %v825_v62 }
  0xf5   :  { %v659_v62 = vpop.f32.mrf.mxu3 }
  0xf8   :  { %v2823_v60 = vpop.f32.mrf.mxu0 }
  0xf9   :  { %v2827_v38 = vpop.f32.mrf.mxu1 }
  0xfa   :  { %1966 = vmatmul.msk.f32.gmra.mxu3 %vm94_vm0, %v436_v44 }
  0xfb   :  { %1983 = vmatmul.msk.f32.gmra.mxu0 %vm94_vm0, %v2544_v6  ;;  %v827_v6 = vld [vmem:[%s3534_s0 + $0x142] sm:$0xff] }
  0xfc   :  { %1945 = vmatmul.msk.f32.gmra.mxu2 %vm94_vm0, %v439_v34  ;;  %2007 = vmatmul.msk.f32.gmra.mxu1 %vm94_vm0, %v826_v2 }
  0xfd   :  { %v662_v30 = vpop.f32.mrf.mxu3 }
 0x100   :  { %v2840_v8 = vpop.f32.mrf.mxu0 }
 0x101   :  { %v2842_v35 = vpop.f32.mrf.mxu1 }
 0x102   :  { %1967 = vmatmul.msk.f32.gmra.mxu3 %vm94_vm0, %v437_v39  ;;  %v349_v39 = vadd.f32 %v2627_v26, %v2625_v25 }
 0x103   :  { %1984 = vmatmul.msk.f32.gmra.mxu0 %vm94_vm0, %v2560_v9  ;;  %v2870_v9 = vpop.f32.mrf.mxu2 }
 0x104   :  { %1946 = vmatmul.msk.f32.gmra.mxu2 %vm94_vm0, %v2847_v58  ;;  %2008 = vmatmul.msk.f32.gmra.mxu1 %vm94_vm0, %v827_v6 }
 0x105   :  { %v665_v44 = vpop.f32.mrf.mxu3 }
 0x108   :  { %v2860_v17 = vpop.f32.mrf.mxu0 }
 0x109   :  { %v2862_v2 = vpop.f32.mrf.mxu1 }
 0x10a   :  { %1968 = vmatmul.msk.f32.gmra.mxu3 %vm94_vm0, %v438_v14 }
 0x10b   :  { %1985 = vmatmul.msk.f32.gmra.mxu0 %vm94_vm0, %v2576_v12  ;;  %v2884_v12 = vpop.f32.mrf.mxu2 }
 0x10c   :  { %2009 = vmatmul.msk.f32.gmra.mxu1 %vm94_vm0, %v828_v0 }
 0x10d   :  { %v668_v21 = vpop.f32.mrf.mxu3 }
 0x110   :  { %v2873_v6 = vpop.f32.mrf.mxu0 }
 0x111   :  { %v2875_v46 = vpop.f32.mrf.mxu1 }
 0x112   :  { %3549 = vst [vmem:[#allocation12_spill] sm:$0xff] %v2875_v46  ;;  %v612_v46 = vadd.f32 %v2784_v43, %v346_v50  ;;  %1969 = vmatmul.msk.f32.gmra.mxu3 %vm94_vm0, %v439_v34 }
 0x113   :  { %1986 = vmatmul.msk.f32.gmra.mxu0 %vm94_vm0, %v2592_v15 }
 0x114   :  { %2010 = vmatmul.msk.f32.gmra.mxu1 %vm94_vm0, %v829_v54 }
 0x115   :  { %v671_v26 = vpop.f32.mrf.mxu3 }
 0x118   :  { %v742_v0 = vpop.f32.mrf.mxu0 }
 0x119   :  { %v743_v22 = vadd.f32 %v742_v0, %v653_v27  ;;  %v927_v10 = vpop.f32.mrf.mxu1 }
 0x11a   :  { %1970 = vmatmul.msk.f32.gmra.mxu3 %vm94_vm0, %v2847_v58 }
 0x11b   :  { %v999_v15 = vadd.f32 %v927_v10, %v743_v22  ;;  %1987 = vmatmul.msk.f32.gmra.mxu0 %vm94_vm0, %v2610_v20  ;;  %v831_v20 = vld [vmem:[%s3534_s0 + $0x1a2] sm:$0xff]  ;;  %v613_v22 = vadd.f32 %v2804_v51, %v349_v39 }
 0x11c   :  { %2011 = vmatmul.msk.f32.gmra.mxu1 %vm94_vm0, %v830_v63  ;;  %v2905_v63 = vpop.f32.mrf.mxu2 }
 0x11d   :  { %v2895_v54 = vmax.f32 %v612_v46, %v999_v15  ;;  %v352_v46 = vadd.f32 %v2642_v32, %v2640_v31  ;;  %v674_v32 = vpop.f32.mrf.mxu3 }
 0x11f   :  { %1071 = vrot.lane.b32.xlu2 %v2895_v54, %s2105_s19 }
 0x120   :  { %v745_v19 = vpop.f32.mrf.mxu0 }
 0x121   :  { %v746_v50 = vadd.f32 %v745_v19, %v656_v47  ;;  %v930_v10 = vpop.f32.mrf.mxu1  ;;  %v614_v47 = vadd.f32 %v2825_v33, %v352_v46  ;;  %v355_v33 = vadd.f32 %v2657_v37, %v2655_v18 }
 0x123   :  { %v1000_v43 = vadd.f32 %v930_v10, %v746_v50  ;;  %1988 = vmatmul.msk.f32.gmra.mxu0 %vm94_vm0, %v2405_v45  ;;  %v832_v45 = vld [vmem:[%s3534_s0 + $0x1ba] sm:$0xff]  ;;  %v615_v39 = vadd.f32 %v2852_v42, %v355_v33  ;;  %v834_v42 = vld [vmem:[%s3534_s0 + $0x1ea] sm:$0xff] }
 0x124   :  { %2012 = vmatmul.msk.f32.gmra.mxu1 %vm94_vm0, %v831_v20  ;;  %v561_v34 = vpop.f32.mrf.mxu2 }
 0x125   :  { %v2911_v14 = vmax.f32 %v613_v22, %v1000_v43  ;;  %v677_v37 = vpop.f32.mrf.mxu3 }
 0x127   :  { %1073 = vrot.lane.b32.xlu0 %v2911_v14, %s2105_s19 }
 0x128   :  { %v748_v25 = vpop.f32.mrf.mxu0 }
 0x129   :  { %v749_v27 = vadd.f32 %v748_v25, %v659_v62  ;;  %v933_v51 = vpop.f32.mrf.mxu1 }
 0x12b   :  { %v1001_v0 = vadd.f32 %v933_v51, %v749_v27  ;;  %1989 = vmatmul.msk.f32.gmra.mxu0 %vm94_vm0, %v2427_v49  ;;  %v833_v49 = vld [vmem:[%s3534_s0 + $0x1d2] sm:$0xff] }
 0x12c   :  { %2013 = vmatmul.msk.f32.gmra.mxu1 %vm94_vm0, %v832_v45  ;;  %v564_v10 = vpop.f32.mrf.mxu2 }
 0x12d   :  { %v2925_v15 = vmax.f32 %v614_v47, %v1001_v0  ;;  %v680_v51 = vpop.f32.mrf.mxu3 }
 0x12f   :  { %1075 = vrot.lane.b32.xlu1 %v2925_v15, %s2105_s19 }
 0x130   :  { %v751_v31 = vpop.f32.mrf.mxu0 }
 0x131   :  { %v752_v62 = vadd.f32 %v751_v31, %v662_v30  ;;  %v936_v19 = vpop.f32.mrf.mxu1  ;;  %v358_v30 = vadd.f32 %v2672_v41, %v2670_v24 }
 0x133   :  { %v1002_v50 = vadd.f32 %v936_v19, %v752_v62  ;;  %1990 = vmatmul.msk.f32.gmra.mxu0 %vm94_vm0, %v2449_v53  ;;  %v616_v53 = vadd.f32 %v2870_v9, %v358_v30  ;;  %v835_v9 = vld [vmem:[%s3534_s0 + $0x202] sm:$0xff] }
 0x134   :  { %2014 = vmatmul.msk.f32.gmra.mxu1 %vm94_vm0, %v833_v49  ;;  %v567_v24 = vpop.f32.mrf.mxu2 }
 0x135   :  { %v2940_v58 = vmax.f32 %v615_v39, %v1002_v50  ;;  %v683_v62 = vpop.f32.mrf.mxu3 }
 0x137   :  { %1077 = vrot.lane.b32.xlu0 %v2940_v58, %s2105_s19 }
 0x138   :  { %v754_v18 = vpop.f32.mrf.mxu0 }
 0x139   :  { %v755_v20 = vadd.f32 %v754_v18, %v665_v44  ;;  %v939_v22 = vpop.f32.mrf.mxu1  ;;  %v361_v44 = vadd.f32 %v2687_v48, %v2685_v29  ;;  %v364_v48 = vadd.f32 %v2702_v59, %v2700_v55  ;;  %v367_v59 = vadd.f32 %v2719_v7, %v2717_v3 }
 0x13a   :  { %v370_v7 = vadd.f32 %v2736_v16, %v2734_v11 }
 0x13b   :  { %v1003_v43 = vadd.f32 %v939_v22, %v755_v20  ;;  %1991 = vmatmul.msk.f32.gmra.mxu0 %vm94_vm0, %v2471_v57  ;;  %v617_v57 = vadd.f32 %v2884_v12, %v361_v44  ;;  %v836_v12 = vld [vmem:[%s3534_s0 + $0x21a] sm:$0xff]  ;;  %v619_v39 = vadd.f32 %v561_v34, %v367_v59 }
 0x13c   :  { %2015 = vmatmul.msk.f32.gmra.mxu1 %vm94_vm0, %v834_v42  ;;  %v570_v31 = vpop.f32.mrf.mxu2  ;;  %v620_v34 = vadd.f32 %v564_v10, %v370_v7 }
 0x13d   :  { %v2953_v25 = vmax.f32 %v616_v53, %v1003_v43  ;;  %v686_v30 = vpop.f32.mrf.mxu3 }
 0x13f   :  { %1079 = vrot.lane.b32.xlu1 %v2953_v25, %s2105_s19 }
 0x140   :  { %v757_v41 = vpop.f32.mrf.mxu0 }
 0x141   :  { %v758_v46 = vadd.f32 %v757_v41, %v668_v21  ;;  %v942_v27 = vpop.f32.mrf.mxu1  ;;  %v373_v41 = vadd.f32 %v2753_v28, %v2751_v23 }
 0x143   :  { %v1004_v45 = vadd.f32 %v942_v27, %v758_v46  ;;  %1992 = vmatmul.msk.f32.gmra.mxu0 %vm94_vm0, %v2493_v61  ;;  %v618_v61 = vadd.f32 %v2905_v63, %v364_v48  ;;  %v837_v63 = vld [vmem:[%s3534_s0 + $0x232] sm:$0xff]  ;;  %v621_v27 = vadd.f32 %v567_v24, %v373_v41  ;;  %v379_v24 = vadd.f32 %v2789_v56, %v2787_v52 }
 0x144   :  { %2016 = vmatmul.msk.f32.gmra.mxu1 %vm94_vm0, %v835_v9  ;;  %v573_v50 = vpop.f32.mrf.mxu2 }
 0x145   :  { %v2966_v47 = vmax.f32 %v617_v57, %v1004_v45  ;;  %v689_v43 = vpop.f32.mrf.mxu3 }
 0x147   :  { %1081 = vrot.lane.b32.xlu2 %v2966_v47, %s2105_s19 }
 0x148   :  { %v760_v29 = vpop.f32.mrf.mxu0 }
 0x149   :  { %v761_v21 = vadd.f32 %v760_v29, %v671_v26  ;;  %v945_v0 = vpop.f32.mrf.mxu1 }
 0x14b   :  { %v1005_v33 = vadd.f32 %v945_v0, %v761_v21  ;;  %1993 = vmatmul.msk.f32.gmra.mxu0 %vm94_vm0, %v2515_v1 }
 0x14c   :  { %2017 = vmatmul.msk.f32.gmra.mxu1 %vm94_vm0, %v836_v12 }
 0x14d   :  { %v2979_v19 = vmax.f32 %v618_v61, %v1005_v33  ;;  %v692_v29 = vpop.f32.mrf.mxu3  ;;  %v623_v61 = vadd.f32 %v573_v50, %v379_v24 }
 0x14f   :  { %1083 = vrot.lane.b32.xlu0 %v2979_v19, %s2105_s19 }
 0x150   :  { %v763_v55 = vpop.f32.mrf.mxu0 }
 0x151   :  { %v764_v26 = vadd.f32 %v763_v55, %v674_v32  ;;  %v948_v49 = vpop.f32.mrf.mxu1 }
 0x153   :  { %v1006_v1 = vadd.f32 %v948_v49, %v764_v26  ;;  %1994 = vmatmul.msk.f32.gmra.mxu0 %vm94_vm0, %v2537_v5  ;;  %v576_v5 = vpop.f32.mrf.mxu2 }
 0x154   :  { %2018 = vmatmul.msk.f32.gmra.mxu1 %vm94_vm0, %v837_v63 }
 0x155   :  { %v2991_v18 = vmax.f32 %v619_v39, %v1006_v1  ;;  %v385_v1 = vadd.f32 %v2827_v38, %v2823_v60 }
 0x157   :  { %1085 = vrot.lane.b32.xlu1 %v2991_v18, %s2105_s19 }
 0x158   :  { %v766_v3 = vpop.f32.mrf.mxu0 }
 0x159   :  { %v767_v32 = vadd.f32 %v766_v3, %v677_v37  ;;  %v951_v20 = vpop.f32.mrf.mxu1  ;;  %v376_v37 = vadd.f32 %v2770_v40, %v2768_v36  ;;  %v695_v36 = vpop.f32.mrf.mxu3 }
 0x15b   :  { %v1007_v22 = vadd.f32 %v951_v20, %v767_v32  ;;  %v579_v16 = vpop.f32.mrf.mxu2  ;;  %v622_v48 = vadd.f32 %v570_v31, %v376_v37  ;;  %v3550_v37 = vld [vmem:[#allocation12_spill] sm:$0xff] }
 0x15c   :  { %v625_v3 = vadd.f32 %v579_v16, %v385_v1 }
 0x15d   :  { %v2997_v42 = vmax.f32 %v620_v34, %v1007_v22  ;;  %v388_v34 = vadd.f32 %v2842_v35, %v2840_v8 }
 0x15f   :  { %1087 = vrot.lane.b32.xlu0 %v2997_v42, %s2105_s19 }
 0x160   :  { %v769_v53 = vpop.f32.mrf.mxu0 }
 0x161   :  { %v770_v44 = vadd.f32 %v769_v53, %v680_v51  ;;  %v954_v46 = vpop.f32.mrf.mxu1  ;;  %v698_v63 = vpop.f32.mrf.mxu3 }
 0x163   :  { %v1008_v9 = vadd.f32 %v954_v46, %v770_v44  ;;  %v582_v12 = vpop.f32.mrf.mxu2  ;;  %v391_v44 = vadd.f32 %v2862_v2, %v2860_v17 }
 0x164   :  { %v626_v53 = vadd.f32 %v582_v12, %v388_v34  ;;  %v3551_v12 = vld [vmem:[#allocation5_spill] sm:$0xff] }
 0x165   :  { %v3003_v11 = vmax.f32 %v621_v27, %v1008_v9 }
 0x167   :  { %1089 = vrot.lane.b32.xlu0 %v3003_v11, %s2105_s19 }
 0x168   :  { %v772_v10 = vpop.f32.mrf.mxu0 }
 0x169   :  { %v773_v57 = vadd.f32 %v772_v10, %v683_v62  ;;  %v957_v45 = vpop.f32.mrf.mxu1  ;;  %v382_v62 = vadd.f32 %v2808_v13, %v2806_v4  ;;  %v701_v20 = vpop.f32.mrf.mxu3 }
 0x16b   :  { %v1009_v21 = vadd.f32 %v957_v45, %v773_v57  ;;  %v624_v26 = vadd.f32 %v576_v5, %v382_v62  ;;  %v585_v52 = vpop.f32.mrf.mxu2  ;;  %v394_v57 = vadd.f32 %v3550_v37, %v2873_v6  ;;  %v3554_v37 = vld [vmem:[#allocation8_spill] sm:$0xff] }
 0x16c   :  { %v627_v16 = vadd.f32 %v585_v52, %v391_v44  ;;  %v3069_v44 = vld [vmem:[%s3536_s2] ss:$0 sm:$0xff] }
 0x16d   :  { %v3009_v23 = vmax.f32 %v622_v48, %v1009_v21 }
 0x16f   :  { %1091 = vrot.lane.b32.xlu1 %v3009_v23, %s2105_s19 }
 0x170   :  { %v775_v28 = vpop.f32.mrf.mxu0 }
 0x171   :  { %v776_v51 = vadd.f32 %v775_v28, %v686_v30  ;;  %v960_v0 = vpop.f32.mrf.mxu1  ;;  %v704_v9 = vpop.f32.mrf.mxu3 }
 0x173   :  { %v1010_v33 = vadd.f32 %v960_v0, %v776_v51  ;;  %v588_v13 = vpop.f32.mrf.mxu2 }
 0x174   :  { %v628_v21 = vadd.f32 %v588_v13, %v394_v57 }
 0x175   :  { %v3015_v40 = vmax.f32 %v623_v61, %v1010_v33 }
 0x177   :  { %1093 = vrot.lane.b32.xlu2 %v3015_v40, %s2105_s19 }
 0x178   :  { %v778_v31 = vpop.f32.mrf.mxu0 }
 0x179   :  { %v779_v55 = vadd.f32 %v778_v31, %v689_v43  ;;  %v963_v59 = vpop.f32.mrf.mxu1  ;;  %v707_v17 = vpop.f32.mrf.mxu3 }
 0x17b   :  { %v1011_v49 = vadd.f32 %v963_v59, %v779_v55  ;;  %v591_v38 = vpop.f32.mrf.mxu2 }
 0x17c   :  { %v629_v61 = vadd.f32 %v591_v38, %v3551_v12 }
 0x17d   :  { %v3021_v56 = vmax.f32 %v624_v26, %v1011_v49  ;;  %v3552_v26 = vld [vmem:[#allocation6_spill] sm:$0xff] }
 0x17f   :  { %1095 = vrot.lane.b32.xlu0 %v3021_v56, %s2105_s19 }
 0x180   :  { %v781_v39 = vpop.f32.mrf.mxu0 }
 0x181   :  { %v782_v50 = vadd.f32 %v781_v39, %v692_v29  ;;  %v966_v30 = vpop.f32.mrf.mxu1  ;;  %v710_v6 = vpop.f32.mrf.mxu3 }
 0x183   :  { %v1012_v7 = vadd.f32 %v966_v30, %v782_v50  ;;  %v594_v48 = vpop.f32.mrf.mxu2 }
 0x184   :  { %v630_v49 = vadd.f32 %v594_v48, %v3552_v26 }
 0x185   :  { %v3027_v4 = vmax.f32 %v625_v3, %v1012_v7 }
 0x187   :  { %1097 = vrot.lane.b32.xlu1 %v3027_v4, %s2105_s19 }
 0x188   :  { %v784_v32 = vpop.f32.mrf.mxu0 }
 0x189   :  { %v785_v22 = vadd.f32 %v784_v32, %v695_v36  ;;  %v969_v5 = vpop.f32.mrf.mxu1  ;;  %v713_v30 = vpop.f32.mrf.mxu3  ;;  %v3553_v32 = vld [vmem:[#allocation7_spill] sm:$0xff] }
 0x18b   :  { %v1013_v43 = vadd.f32 %v969_v5, %v785_v22  ;;  %v597_v36 = vpop.f32.mrf.mxu2 }
 0x18d   :  { %v3033_v60 = vmax.f32 %v626_v53, %v1013_v43  ;;  %v1072_v53 = vpop.permute.xlu2 %1071 }
 0x18f   :  { %1099 = vrot.lane.b32.xlu2 %v3033_v60, %s2105_s19 }
 0x190   :  { %v787_v41 = vpop.f32.mrf.mxu0 }
 0x191   :  { %v788_v46 = vadd.f32 %v787_v41, %v698_v63  ;;  %v972_v27 = vpop.f32.mrf.mxu1 }
 0x193   :  { %v1014_v10 = vadd.f32 %v972_v27, %v788_v46  ;;  %v600_v1 = vpop.f32.mrf.mxu2 }
 0x195   :  { %v3039_v8 = vmax.f32 %v627_v16, %v1014_v10 }
 0x197   :  { %1101 = vrot.lane.b32.xlu2 %v3039_v8, %s2105_s19 }
 0x198   :  { %v790_v35 = vpop.f32.mrf.mxu0 }
 0x199   :  { %v791_v45 = vadd.f32 %v790_v35, %v701_v20  ;;  %v975_v29 = vpop.f32.mrf.mxu1  ;;  %v1074_v52 = vpop.permute.xlu0 %1073  ;;  %v631_v20 = vadd.f32 %v597_v36, %v3553_v32 }
 0x19a   :  { %v716_v35 = vpop.f32.mrf.mxu3 }
 0x19b   :  { %v1015_v28 = vadd.f32 %v975_v29, %v791_v45  ;;  %v603_v41 = vpop.f32.mrf.mxu2  ;;  %v1144_v29 = vmax.f32 %v2911_v14, %v1074_v52 }
 0x19d   :  { %v3045_v2 = vmax.f32 %v628_v21, %v1015_v28 }
 0x19f   :  { %1103 = vrot.lane.b32.xlu2 %v3045_v2, %s2105_s19 }
 0x1a0   :  { %v793_v24 = vpop.f32.mrf.mxu0 }
 0x1a1   :  { %v794_v51 = vadd.f32 %v793_v24, %v704_v9  ;;  %v978_v0 = vpop.f32.mrf.mxu1  ;;  %v1076_v3 = vpop.permute.xlu1 %1075 }
 0x1a2   :  { %v1145_v38 = vmax.f32 %v2925_v15, %v1076_v3  ;;  %v1143_v15 = vmax.f32 %v2895_v54, %v1072_v53  ;;  %v1082_v28 = vpop.permute.xlu2 %1081 }
 0x1a3   :  { %v1016_v33 = vadd.f32 %v978_v0, %v794_v51  ;;  %v1172_v0 = vadd.f32 %v3069_v44, %v1144_v29 }
 0x1a4   :  { %v1173_v57 = vadd.f32 %v3069_v44, %v1145_v38  ;;  %v1171_v24 = vadd.f32 %v3069_v44, %v1143_v15 }
 0x1a5   :  { %v3050_v31 = vmax.f32 %v629_v61, %v1016_v33  ;;  %v1148_v61 = vmax.f32 %v2966_v47, %v1082_v28  ;;  %v719_v47 = vpop.f32.mrf.mxu3 }
 0x1a6   :  { %v1197_v51 = vmax.f32 %v1173_v57, 0.0  ;;  %v1195_v26 = vmax.f32 %v1171_v24, 0.0 }
 0x1a7   :  { %1105 = vrot.lane.b32.xlu2 %v3050_v31, %s2105_s19 }
 0x1a8   :  { %v796_v62 = vpop.f32.mrf.mxu0 }
 0x1a9   :  { %v797_v55 = vadd.f32 %v796_v62, %v707_v17  ;;  %v981_v59 = vpop.f32.mrf.mxu1  ;;  %v1078_v34 = vpop.permute.xlu0 %1077 }
 0x1aa   :  { %v1146_v43 = vmax.f32 %v2940_v58, %v1078_v34  ;;  %v632_v58 = vadd.f32 %v600_v1, %v3554_v37 }
 0x1ab   :  { %v1017_v63 = vadd.f32 %v981_v59, %v797_v55 }
 0x1ac   :  { %v1174_v16 = vadd.f32 %v3069_v44, %v1146_v43 }
 0x1ad   :  { %v3055_v39 = vmax.f32 %v630_v49, %v1017_v63  ;;  %v2106_v49 = vmov 1983009808   ;;  %v1219_v63 = vrot.slane %v1197_v51, 4 }
 0x1ae   :  { %v1198_v17 = vmax.f32 %v1174_v16, 0.0  ;;  %v1225_v52 = vunpack.c.l.s4 %v2106_v49 }
 0x1af   :  { %1107 = vrot.lane.b32.xlu0 %v3055_v39, %s2105_s19 }
 0x1b0   :  { %v799_v50 = vpop.f32.mrf.mxu0  ;;  %v1232_v62 = vrot.slane %v1198_v17, 4  ;;  %v3094_v34 = vunpack.c.0.s8 %v1225_v52 }
 0x1b1   :  { %v800_v7 = vadd.f32 %v799_v50, %v710_v6  ;;  %v984_v13 = vpop.f32.mrf.mxu1  ;;  %v1080_v27 = vpop.permute.xlu1 %1079  ;;  %v1196_v50 = vmax.f32 %v1172_v0, 0.0 }
 0x1b2   :  { %v1147_v48 = vmax.f32 %v2953_v25, %v1080_v27  ;;  %v3555_v25 = vld [vmem:[#allocation9_spill] sm:$0xff]  ;;  %v3086_v6 = vpop.f32.mrf.mxu2 }
 0x1b3   :  { %v1018_v22 = vadd.f32 %v984_v13, %v800_v7  ;;  %v633_v36 = vadd.f32 %v603_v41, %v3555_v25  ;;  %v1176_v7 = vadd.f32 %v3069_v44, %v1148_v61  ;;  %v1233_v32 = vsel %vm1220_vm1, %v1232_v62, %v1196_v50 }
 0x1b4   :  { %v1175_v54 = vadd.f32 %v3069_v44, %v1147_v48  ;;  %v1234_v41 = vrot.slane %v1196_v50, 4 }
 0x1b5   :  { %v3060_v5 = vmax.f32 %v631_v20, %v1018_v22  ;;  %v1221_v22 = vsel %vm1220_vm1, %v1219_v63, %v1195_v26  ;;  %v1200_v27 = vmax.f32 %v1176_v7, 0.0 }
 0x1b6   :  { %v1235_v15 = vsel %vm1220_vm1, %v1198_v17, %v1234_v41  ;;  %v722_v17 = vpop.f32.mrf.mxu3 }
 0x1b7   :  { %1109 = vrot.lane.b32.xlu1 %v3060_v5, %s2105_s19  ;;  %v1243_v61 = vperm.slane %v1235_v15, %v3094_v34 }
 0x1b8   :  { %v802_v46 = vpop.f32.mrf.mxu0 }
 0x1b9   :  { %v803_v9 = vadd.f32 %v802_v46, %v713_v30  ;;  %v987_v10 = vpop.f32.mrf.mxu1  ;;  %v1199_v30 = vmax.f32 %v1175_v54, 0.0 }
 0x1ba   :  { %v609_v48 = vpop.f32.mrf.mxu2 }
 0x1bb   :  { %v1019_v45 = vadd.f32 %v987_v10, %v803_v9  ;;  %v1246_v53 = vrot.slane %v1199_v30, 4  ;;  %v1239_v9 = vperm.slane %v1233_v32, %v3094_v34  ;;  %v1227_v10 = vperm.slane %v1221_v22, %v3094_v34 }
 0x1bd   :  { %v3077_v21 = vmax.f32 %v632_v58, %v1019_v45  ;;  %v2107_v45 = vmov 1934713408   ;;  %v1268_v0 = vrot.slane %v1239_v9, 4 }
 0x1be   :  { %v1273_v29 = vunpack.c.l.s4 %v2107_v45 }
 0x1bf   :  { %1111 = vrot.lane.b32.xlu2 %v3077_v21, %s2105_s19  ;;  %v1269_v50 = vsel %vm1220_vm1, %v1268_v0, %v1227_v10 }
 0x1c0   :  { %v805_v12 = vpop.f32.mrf.mxu0 }
 0x1c1   :  { %v806_v14 = vadd.f32 %v805_v12, %v716_v35  ;;  %v1084_v33 = vpop.permute.xlu0 %1083  ;;  %v990_v59 = vpop.f32.mrf.mxu1  ;;  %v1270_v12 = vrot.slane %v1227_v10, 4 }
 0x1c2   :  { %v1149_v55 = vmax.f32 %v2979_v19, %v1084_v33  ;;  %v1222_v19 = vrot.slane %v1195_v26, 4  ;;  %v3556_v33 = vld [vmem:[#allocation11_spill] sm:$0xff] }
 0x1c3   :  { %v1020_v1 = vadd.f32 %v990_v59, %v806_v14  ;;  %v635_v25 = vadd.f32 %v609_v48, %v3556_v33  ;;  %v1271_v49 = vsel %vm1220_vm1, %v1239_v9, %v1270_v12  ;;  %v3557_v33 = vld [vmem:[#allocation10_spill] sm:$0xff] }
 0x1c4   :  { %v1177_v3 = vadd.f32 %v3069_v44, %v1149_v55  ;;  %v1223_v46 = vsel %vm1220_vm1, %v1197_v51, %v1222_v19  ;;  %v1258_v51 = vrot.slane %v1200_v27, 4 }
 0x1c5   :  { %v3091_v13 = vmax.f32 %v633_v36, %v1020_v1  ;;  %v1231_v28 = vperm.slane %v1223_v46, %v3094_v34  ;;  %v3112_v36 = vunpack.c.0.s8 %v1273_v29 }
 0x1c6   :  { %v1201_v20 = vmax.f32 %v1177_v3, 0.0 }
 0x1c7   :  { %1113 = vrot.lane.b32.xlu0 %v3091_v13, %s2105_s19  ;;  %v1282_v62 = vrot.slane %v1231_v28, 4  ;;  %v1275_v46 = vperm.slane %v1269_v50, %v3112_v36  ;;  %v1279_v9 = vperm.slane %v1271_v49, %v3112_v36 }
 0x1c8   :  { %v1244_v43 = vrot.slane %v1201_v20, 4  ;;  %v808_v38 = vpop.f32.mrf.mxu0  ;;  %v1247_v35 = vsel %vm1220_vm1, %v1201_v20, %v1246_v53 }
 0x1c9   :  { %v1086_v16 = vpop.permute.xlu1 %1085  ;;  %v993_v58 = vpop.f32.mrf.mxu1  ;;  %v1255_v54 = vperm.slane %v1247_v35, %v3094_v34  ;;  %v1283_v20 = vsel %vm1220_vm1, %v1243_v61, %v1282_v62  ;;  %v809_v41 = vadd.f32 %v808_v38, %v719_v47  ;;  %v1322_v0 = vrot.slane %v1279_v9, 4 }
 0x1ca   :  { %v1150_v37 = vmax.f32 %v2991_v18, %v1086_v16  ;;  %v1245_v57 = vsel %vm1220_vm1, %v1244_v43, %v1199_v30  ;;  %v1280_v30 = vrot.slane %v1243_v61, 4  ;;  %v1291_v38 = vperm.slane %v1283_v20, %v3112_v36 }
 0x1cb   :  { %v1251_v18 = vperm.slane %v1245_v57, %v3094_v34  ;;  %v1306_v52 = vrot.slane %v1255_v54, 4 }
 0x1cc   :  { %v1178_v24 = vadd.f32 %v3069_v44, %v1150_v37  ;;  %v1281_v57 = vsel %vm1220_vm1, %v1280_v30, %v1231_v28  ;;  %v1330_v50 = vrot.slane %v1291_v38, 4 }
 0x1cd   :  { %v1294_v3 = vrot.slane %v1251_v18, 4  ;;  %v1287_v12 = vperm.slane %v1281_v57, %v3112_v36 }
 0x1ce   :  { %v1202_v14 = vmax.f32 %v1178_v24, 0.0  ;;  %v1318_v24 = vrot.slane %v1275_v46, 4 }
 0x1d0   :  { %v1256_v55 = vrot.slane %v1202_v14, 4  ;;  %v1259_v59 = vsel %vm1220_vm1, %v1202_v14, %v1258_v51  ;;  %v811_v26 = vpop.f32.mrf.mxu0 }
 0x1d1   :  { %v1267_v63 = vperm.slane %v1259_v59, %v3094_v34  ;;  %v812_v1 = vadd.f32 %v811_v26, %v722_v17  ;;  %v996_v32 = vpop.f32.mrf.mxu1  ;;  %v1088_v49 = vpop.permute.xlu0 %1087 }
 0x1d2   :  { %v1257_v7 = vsel %vm1220_vm1, %v1256_v55, %v1200_v27  ;;  %v1094_v30 = vpop.permute.xlu2 %1093 }
 0x1d3   :  { %v1263_v19 = vperm.slane %v1257_v7, %v3094_v34  ;;  %v1304_v22 = vrot.slane %v1267_v63, 4  ;;  %v1022_v53 = vadd.f32 %v996_v32, %v812_v1  ;;  %v1307_v43 = vsel %vm1220_vm1, %v1267_v63, %v1306_v52  ;;  %v1632_v52 = vld [vmem:[%s3537_s3 + $0x78] sm:$0xff] }
 0x1d4   :  { %v1315_v16 = vperm.slane %v1307_v43, %v3112_v36  ;;  %v1326_v63 = vrot.slane %v1287_v12, 4  ;;  %1685 = vmatpush.msra.mxu2 %v1632_v52  ;;  %v1154_v43 = vmax.f32 %v3015_v40, %v1094_v30 }
 0x1d5   :  { %v1292_v10 = vrot.slane %v1263_v19, 4  ;;  %v3125_v35 = vmax.f32 %v635_v25, %v1022_v53  ;;  %v1295_v27 = vsel %vm1220_vm1, %v1263_v19, %v1294_v3  ;;  %v1305_v37 = vsel %vm1220_vm1, %v1304_v22, %v1255_v54  ;;  %v1631_v19 = vld [vmem:[%s3537_s3 + $0x70] sm:$0xff] }
 0x1d6   :  { %v1303_v15 = vperm.slane %v1295_v27, %v3112_v36  ;;  %v1311_v45 = vperm.slane %v1305_v37, %v3112_v36  ;;  %v1328_v29 = vrot.slane %v1315_v16, 4  ;;  %v1021_v54 = vadd.f32 %v993_v58, %v809_v41  ;;  %v1647_v22 = vld [vmem:[%s3537_s3 + $0xf0] sm:$0xff]  ;;  %1686 = vmatpush.msra.mxu2 %v1631_v19 }
 0x1d7   :  { %1117 = vrot.lane.b32.xlu1 %v3125_v35, %s2105_s19  ;;  %v1293_v47 = vsel %vm1220_vm1, %v1292_v10, %v1251_v18  ;;  %v634_v25 = vadd.f32 %v3086_v6, %v3557_v33  ;;  %v1648_v6 = vld [vmem:[%s3537_s3 + $0xf8] sm:$0xff]  ;;  %v1331_v7 = vsel %vm1220_vm1, %v1315_v16, %v1330_v50  ;;  %v1646_v10 = vld [vmem:[%s3537_s3 + $0xe8] sm:$0xff]  ;;  %v1182_v27 = vadd.f32 %v3069_v44, %v1154_v43 }
 0x1d8   :  { %v1299_v48 = vperm.slane %v1293_v47, %v3112_v36  ;;  %v1320_v51 = vrot.slane %v1303_v15, 4  ;;  %v1324_v61 = vrot.slane %v1311_v45, 4  ;;  %v3139_v28 = vsel %vm1220_vm1, %v1328_v29, %v1291_v38  ;;  %1711 = vmatpush.msra.mxu3 %v1648_v6 }
 0x1d9   :  { %v1323_v17 = vsel %vm1220_vm1, %v1303_v15, %v1322_v0  ;;  %v3154_v26 = vmax.f32 %v634_v25, %v1021_v54  ;;  %v1327_v1 = vsel %vm1220_vm1, %v1311_v45, %v1326_v63  ;;  %v1090_v53 = vpop.permute.xlu0 %1089  ;;  %v1206_v45 = vmax.f32 %v1182_v27, 0.0  ;;  %v1645_v0 = vld [vmem:[%s3537_s3 + $0xe0] sm:$0xff] }
 0x1da   :  { %v1319_v14 = vsel %vm1220_vm1, %v1299_v48, %v1318_v24  ;;  %v1316_v18 = vrot.slane %v1299_v48, 4  ;;  %v3146_v55 = vsel %vm1220_vm1, %v1320_v51, %v1279_v9  ;;  %v3149_v58 = vsel %vm1220_vm1, %v1324_v61, %v1287_v12  ;;  %1712 = vmatpush.msra.mxu3 %v1647_v22 }
 0x1db   :  { %v2046_v62 = vpack.i.bf16 %v1323_v17, %v1319_v14  ;;  %v2061_v32 = vpack.i.bf16 %v1331_v7, %v1327_v1  ;;  %v1151_v9 = vmax.f32 %v2997_v42, %v1088_v49  ;;  %v1152_v16 = vmax.f32 %v3003_v11, %v1090_v53 }
 0x1dc   :  { %v3152_v59 = vsel %vm1220_vm1, %v1316_v18, %v1275_v46  ;;  %1713 = vmatpush.msra.mxu3 %v1646_v10  ;;  %v1344_v54 = vrot.slane %v1206_v45, 4 }
 0x1dd   :  { %2047 = vrot.lane.b32.xlu0 %v2046_v62, %s2105_s19  ;;  %v1179_v15 = vadd.f32 %v3069_v44, %v1151_v9  ;;  %v1180_v57 = vadd.f32 %v3069_v44, %v1152_v16 }
 0x1de   :  { %1714 = vmatpush.msra.mxu3 %v1645_v0 }
 0x1df   :  { %1115 = vrot.lane.b32.xlu1 %v3154_v26, %s2105_s19  ;;  %v1203_v29 = vmax.f32 %v1179_v15, 0.0  ;;  %v1204_v48 = vmax.f32 %v1180_v57, 0.0 }
 0x1e1   :  { %v1092_v3 = vpop.permute.xlu1 %1091  ;;  %v1346_v18 = vrot.slane %v1204_v48, 4  ;;  %v1334_v25 = vrot.slane %v1203_v29, 4 }
 0x1e2   :  { %v1153_v20 = vmax.f32 %v3009_v23, %v1092_v3  ;;  %v1630_v23 = vld [vmem:[%s3537_s3 + $0x68] sm:$0xff] }
 0x1e3   :  { %1687 = vmatpush.msra.mxu2 %v1630_v23  ;;  %v1347_v3 = vsel %vm1220_vm1, %v1206_v45, %v1346_v18 }
 0x1e4   :  { %v1181_v41 = vadd.f32 %v3069_v44, %v1153_v20  ;;  %v1355_v43 = vperm.slane %v1347_v3, %v3094_v34 }
 0x1e5   :  { %2062 = vrot.lane.b32.xlu0 %v2061_v32, %s2105_s19 }
 0x1e6   :  { %v1205_v37 = vmax.f32 %v1181_v41, 0.0  ;;  %v1392_v15 = vrot.slane %v1355_v43, 4 }
 0x1e8   :  { %v1332_v47 = vrot.slane %v1205_v37, 4  ;;  %v1335_v63 = vsel %vm1220_vm1, %v1205_v37, %v1334_v25 }
 0x1e9   :  { %v1100_v46 = vpop.permute.xlu2 %1099  ;;  %v1343_v22 = vperm.slane %v1335_v63, %v3094_v34 }
 0x1ea   :  { %v1157_v40 = vmax.f32 %v3033_v60, %v1100_v46  ;;  %v1629_v60 = vld [vmem:[%s3537_s3 + $0x60] sm:$0xff]  ;;  %v1333_v12 = vsel %vm1220_vm1, %v1332_v47, %v1203_v29 }
 0x1eb   :  { %1688 = vmatpush.msra.mxu2 %v1629_v60  ;;  %v1339_v33 = vperm.slane %v1333_v12, %v3094_v34  ;;  %v1394_v27 = vrot.slane %v1343_v22, 4 }
 0x1ec   :  { %v1185_v42 = vadd.f32 %v3069_v44, %v1157_v40 }
 0x1ed   :  { %v1382_v7 = vrot.slane %v1339_v33, 4  ;;  %v1395_v0 = vsel %vm1220_vm1, %v1355_v43, %v1394_v27  ;;  %v1624_v27 = vld [vmem:[%s3537_s3 + $0x38] sm:$0xff] }
 0x1ee   :  { %v1209_v61 = vmax.f32 %v1185_v42, 0.0 }
 0x1f0   :  { %v1356_v62 = vrot.slane %v1209_v61, 4 }
 0x1f1   :  { %v1096_v38 = vpop.permute.xlu0 %1095  ;;  %v1102_v11 = vpop.permute.xlu2 %1101 }
 0x1f2   :  { %v1155_v24 = vmax.f32 %v3021_v56, %v1096_v38  ;;  %v1158_v51 = vmax.f32 %v3039_v8, %v1102_v11  ;;  %v1345_v56 = vsel %vm1220_vm1, %v1344_v54, %v1204_v48 }
 0x1f3   :  { %v1351_v52 = vperm.slane %v1345_v56, %v3094_v34 }
 0x1f4   :  { %v1183_v14 = vadd.f32 %v3069_v44, %v1155_v24  ;;  %v1186_v8 = vadd.f32 %v3069_v44, %v1158_v51  ;;  %v1393_v24 = vsel %vm1220_vm1, %v1392_v15, %v1343_v22  ;;  %v1639_v15 = vld [vmem:[%s3537_s3 + $0xb0] sm:$0xff] }
 0x1f5   :  { %v1380_v19 = vrot.slane %v1351_v52, 4  ;;  %v1383_v9 = vsel %vm1220_vm1, %v1351_v52, %v1382_v7 }
 0x1f6   :  { %v1207_v17 = vmax.f32 %v1183_v14, 0.0  ;;  %v1210_v50 = vmax.f32 %v1186_v8, 0.0  ;;  %v1391_v47 = vperm.slane %v1383_v9, %v3112_v36  ;;  %v1642_v9 = vld [vmem:[%s3537_s3 + $0xc8] sm:$0xff] }
 0x1f8   :  { %v1358_v49 = vrot.slane %v1207_v17, 4  ;;  %v1357_v1 = vsel %vm1220_vm1, %v1356_v62, %v1207_v17  ;;  %v1368_v41 = vrot.slane %v1210_v50, 4  ;;  %v1434_v14 = vrot.slane %v1391_v47, 4 }
 0x1f9   :  { %v1098_v6 = vpop.permute.xlu1 %1097  ;;  %v1363_v53 = vperm.slane %v1357_v1, %v3094_v34  ;;  %v1399_v17 = vperm.slane %v1393_v24, %v3112_v36  ;;  %v1403_v62 = vperm.slane %v1395_v0, %v3112_v36  ;;  %v1618_v24 = vld [vmem:[%s3537_s3 + $0x8] sm:$0xff]  ;;  %v1633_v0 = vld [vmem:[%s3537_s3 + $0x80] sm:$0xff] }
 0x1fa   :  { %v1156_v30 = vmax.f32 %v3027_v4, %v1098_v6  ;;  %v1359_v32 = vsel %vm1220_vm1, %v1209_v61, %v1358_v49  ;;  %v1381_v4 = vsel %vm1220_vm1, %v1380_v19, %v1339_v33  ;;  %v1644_v19 = vld [vmem:[%s3537_s3 + $0xd8] sm:$0xff] }
 0x1fb   :  { %v1367_v46 = vperm.slane %v1359_v32, %v3094_v34  ;;  %v1406_v37 = vrot.slane %v1363_v53, 4  ;;  %v1387_v45 = vperm.slane %v1381_v4, %v3112_v36  ;;  %v1438_v7 = vrot.slane %v1399_v17, 4  ;;  %1715 = vmatpush.msra.mxu3 %v1644_v19  ;;  %v1626_v4 = vld [vmem:[%s3537_s3 + $0x48] sm:$0xff] }
 0x1fc   :  { %v1184_v20 = vadd.f32 %v3069_v44, %v1156_v30 }
 0x1fd   :  { %v1418_v42 = vrot.slane %v1367_v46, 4  ;;  %v1430_v61 = vrot.slane %v1387_v45, 4 }
 0x1fe   :  { %v1208_v23 = vmax.f32 %v1184_v20, 0.0  ;;  %v1628_v20 = vld [vmem:[%s3537_s3 + $0x58] sm:$0xff] }
 0x1ff   :  { %1689 = vmatpush.msra.mxu2 %v1628_v20 }
 0x200   :  { %v1369_v16 = vsel %vm1220_vm1, %v1368_v41, %v1208_v23  ;;  %v1370_v10 = vrot.slane %v1208_v23, 4  ;;  %v1627_v23 = vld [vmem:[%s3537_s3 + $0x50] sm:$0xff] }
 0x201   :  { %v1375_v40 = vperm.slane %v1369_v16, %v3094_v34  ;;  %1690 = vmatpush.msra.mxu2 %v1627_v23  ;;  %v1625_v16 = vld [vmem:[%s3537_s3 + $0x40] sm:$0xff] }
 0x202   :  { %v1371_v57 = vsel %vm1220_vm1, %v1210_v50, %v1370_v10  ;;  %v1641_v10 = vld [vmem:[%s3537_s3 + $0xc0] sm:$0xff] }
 0x203   :  { %v1379_v38 = vperm.slane %v1371_v57, %v3094_v34  ;;  %v1404_v11 = vrot.slane %v1375_v40, 4  ;;  %v1407_v29 = vsel %vm1220_vm1, %v1375_v40, %v1406_v37  ;;  %1691 = vmatpush.msra.mxu2 %v1626_v4  ;;  %v1640_v37 = vld [vmem:[%s3537_s3 + $0xb8] sm:$0xff]  ;;  %v1623_v40 = vld [vmem:[%s3537_s3 + $0x30] sm:$0xff]  ;;  %v1622_v57 = vld [vmem:[%s3537_s3 + $0x28] sm:$0xff] }
 0x204   :  { %v1415_v48 = vperm.slane %v1407_v29, %v3112_v36  ;;  %v1619_v29 = vld [vmem:[%s3537_s3 + $0x10] sm:$0xff] }
 0x205   :  { %v1416_v51 = vrot.slane %v1379_v38, 4  ;;  %v1405_v60 = vsel %vm1220_vm1, %v1404_v11, %v1363_v53  ;;  %v1419_v54 = vsel %vm1220_vm1, %v1379_v38, %v1418_v42  ;;  %v1442_v53 = vrot.slane %v1403_v62, 4  ;;  %1692 = vmatpush.msra.mxu2 %v1625_v16  ;;  %v1637_v42 = vld [vmem:[%s3537_s3 + $0xa0] sm:$0xff]  ;;  %v1620_v38 = vld [vmem:[%s3537_s3 + $0x18] sm:$0xff] }
 0x206   :  { %v1411_v12 = vperm.slane %v1405_v60, %v3112_v36  ;;  %v1427_v56 = vperm.slane %v1419_v54, %v3112_v36  ;;  %v1432_v18 = vrot.slane %v1415_v48, 4  ;;  %v1435_v25 = vsel %vm1220_vm1, %v1415_v48, %v1434_v14  ;;  %v1636_v11 = vld [vmem:[%s3537_s3 + $0x98] sm:$0xff]  ;;  %v1635_v48 = vld [vmem:[%s3537_s3 + $0x90] sm:$0xff]  ;;  %v1617_v60 = vld [vmem:[%s3537_s3] sm:$0xff]  ;;  %v1104_v54 = vpop.permute.xlu2 %1103 }
 0x207   :  { %v1417_v8 = vsel %vm1220_vm1, %v1416_v51, %v1367_v46  ;;  %v1643_v46 = vld [vmem:[%s3537_s3 + $0xd0] sm:$0xff]  ;;  %1693 = vmatpush.msra.mxu2 %v1624_v27  ;;  %v1634_v51 = vld [vmem:[%s3537_s3 + $0x88] sm:$0xff] }
 0x208   :  { %v1431_v33 = vsel %vm1220_vm1, %v1411_v12, %v1430_v61  ;;  %v1423_v49 = vperm.slane %v1417_v8, %v3112_v36  ;;  %v1428_v6 = vrot.slane %v1411_v12, 4  ;;  %v3237_v63 = vsel %vm1220_vm1, %v1432_v18, %v1391_v47  ;;  %1716 = vmatpush.msra.mxu3 %v1643_v46  ;;  %v1621_v47 = vld [vmem:[%s3537_s3 + $0x20] sm:$0xff] }
 0x209   :  { %v2051_v52 = vpack.i.bf16 %v1435_v25, %v1431_v33  ;;  %v1440_v1 = vrot.slane %v1427_v56, 4  ;;  %v1443_v43 = vsel %vm1220_vm1, %v1427_v56, %v1442_v53  ;;  %1694 = vmatpush.msra.mxu2 %v1623_v40 }
 0x20a   :  { %v1436_v50 = vrot.slane %v1423_v49, 4  ;;  %v3241_v30 = vsel %vm1220_vm1, %v1428_v6, %v1387_v45  ;;  %v1439_v22 = vsel %vm1220_vm1, %v1423_v49, %v1438_v7  ;;  %1717 = vmatpush.msra.mxu3 %v1642_v9  ;;  %v1638_v45 = vld [vmem:[%s3537_s3 + $0xa8] sm:$0xff]  ;;  %v1159_v49 = vmax.f32 %v3045_v2, %v1104_v54 }
 0x20b   :  { %2052 = vrot.lane.b32.xlu1 %v2051_v52, %s2105_s19  ;;  %v3244_v3 = vsel %vm1220_vm1, %v1440_v1, %v1403_v62  ;;  %v2066_v41 = vpack.i.bf16 %v1443_v43, %v1439_v22  ;;  %1695 = vmatpush.msra.mxu2 %v1622_v57 }
 0x20c   :  { %v3247_v32 = vsel %vm1220_vm1, %v1436_v50, %v1399_v17  ;;  %1718 = vmatpush.msra.mxu3 %v1641_v10 }
 0x20d   :  { %1696 = vmatpush.msra.mxu2 %v1621_v47 }
 0x20e   :  { %1719 = vmatpush.msra.mxu3 %v1640_v37  ;;  %v1106_v14 = vpop.permute.xlu2 %1105 }
 0x20f   :  { %1697 = vmatpush.msra.mxu2 %v1620_v38  ;;  %v1160_v33 = vmax.f32 %v3050_v31, %v1106_v14 }
 0x210   :  { %1720 = vmatpush.msra.mxu3 %v1639_v15 }
 0x211   :  { %1698 = vmatpush.msra.mxu2 %v1619_v29  ;;  %v1188_v1 = vadd.f32 %v3069_v44, %v1160_v33 }
 0x212   :  { %1721 = vmatpush.msra.mxu3 %v1638_v45 }
 0x213   :  { %2067 = vrot.lane.b32.xlu1 %v2066_v41, %s2105_s19  ;;  %1699 = vmatpush.msra.mxu2 %v1618_v24  ;;  %v1212_v22 = vmax.f32 %v1188_v1, 0.0 }
 0x214   :  { %1722 = vmatpush.msra.mxu3 %v1637_v42 }
 0x215   :  { %1700 = vmatpush.msra.mxu2 %v1617_v60  ;;  %v1458_v4 = vrot.slane %v1212_v22, 4 }
 0x216   :  { %1723 = vmatpush.msra.mxu3 %v1636_v11 }
 0x218   :  { %1724 = vmatpush.msra.mxu3 %v1635_v48 }
 0x219   :  { %v1112_v52 = vpop.permute.xlu2 %1111 }
 0x21a   :  { %1725 = vmatpush.msra.mxu3 %v1634_v51  ;;  %v1163_v7 = vmax.f32 %v3077_v21, %v1112_v52 }
 0x21c   :  { %1726 = vmatpush.msra.mxu3 %v1633_v0  ;;  %v1191_v41 = vadd.f32 %v3069_v44, %v1163_v7 }
 0x21e   :  { %v1215_v40 = vmax.f32 %v1191_v41, 0.0 }
 0x220   :  { %v1470_v54 = vrot.slane %v1215_v40, 4 }
 0x221   :  { %v1108_v12 = vpop.permute.xlu0 %1107 }
 0x222   :  { %v1161_v17 = vmax.f32 %v3055_v39, %v1108_v12  ;;  %v1187_v39 = vadd.f32 %v3069_v44, %v1159_v49 }
 0x224   :  { %v1189_v25 = vadd.f32 %v3069_v44, %v1161_v17  ;;  %v1211_v43 = vmax.f32 %v1187_v39, 0.0 }
 0x226   :  { %v1213_v50 = vmax.f32 %v1189_v25, 0.0  ;;  %v1446_v37 = vrot.slane %v1211_v43, 4 }
 0x228   :  { %v1444_v53 = vrot.slane %v1213_v50, 4  ;;  %v1447_v29 = vsel %vm1220_vm1, %v1213_v50, %v1446_v37 }
 0x229   :  { %v1110_v61 = vpop.permute.xlu1 %1109 }
 0x22a   :  { %v1162_v56 = vmax.f32 %v3060_v5, %v1110_v61  ;;  %v1445_v9 = vsel %vm1220_vm1, %v1444_v53, %v1211_v43 }
 0x22b   :  { %v1451_v48 = vperm.slane %v1445_v9, %v3094_v34 }
 0x22c   :  { %v1190_v18 = vadd.f32 %v3069_v44, %v1162_v56 }
 0x22e   :  { %v1214_v6 = vmax.f32 %v1190_v18, 0.0 }
 0x230   :  { %v1456_v19 = vrot.slane %v1214_v6, 4  ;;  %v1459_v15 = vsel %vm1220_vm1, %v1214_v6, %v1458_v4 }
 0x231   :  { %v1467_v24 = vperm.slane %v1459_v15, %v3094_v34 }
 0x232   :  { %v1457_v23 = vsel %vm1220_vm1, %v1456_v19, %v1212_v22 }
 0x233   :  { %v1463_v57 = vperm.slane %v1457_v23, %v3094_v34  ;;  %v1504_v14 = vrot.slane %v1467_v24, 4 }
 0x235   :  { %v1492_v0 = vrot.slane %v1463_v57, 4 }
 0x237   :  { %v1493_v33 = vsel %vm1220_vm1, %v1492_v0, %v1451_v48 }
 0x238   :  { %v1499_v50 = vperm.slane %v1493_v33, %v3112_v36  ;;  %v1655_v33 = vld [vmem:[%s3537_s3 + $0x130] sm:$0xff] }
 0x239   :  { %v1114_v8 = vpop.permute.xlu0 %1113 }
 0x23a   :  { %v1164_v62 = vmax.f32 %v3091_v13, %v1114_v8  ;;  %v1542_v23 = vrot.slane %v1499_v50, 4 }
 0x23c   :  { %v1192_v5 = vadd.f32 %v3069_v44, %v1164_v62 }
 0x23e   :  { %v1216_v13 = vmax.f32 %v1192_v5, 0.0 }
 0x240   :  { %v1482_v21 = vrot.slane %v1216_v13, 4 }
 0x249   :  { %v1118_v20 = vpop.permute.xlu1 %1117 }
 0x24a   :  { %v1166_v31 = vmax.f32 %v3125_v35, %v1118_v20 }
 0x24c   :  { %v1194_v2 = vadd.f32 %v3069_v44, %v1166_v31 }
 0x24e   :  { %v1218_v46 = vmax.f32 %v1194_v2, 0.0 }
 0x24f   :  { %v2048_v16 = vpop.permute.xlu0 %2047 }
 0x250   :  { %v1480_v10 = vrot.slane %v1218_v46, 4  ;;  %v2050_v27 = vunpack.i.h.bf16 %v2048_v16  ;;  %v2049_v35 = vunpack.i.l.bf16 %v2048_v16  ;;  %v1483_v47 = vsel %vm1220_vm1, %v1218_v46, %v1482_v21 }
 0x251   :  { %v1116_v45 = vpop.permute.xlu1 %1115 }
 0x252   :  { %v1165_v42 = vmax.f32 %v3154_v26, %v1116_v45  ;;  %v1605_v38 = vsel %vm1604_vm2, %v3152_v59, %v2049_v35  ;;  %v1608_v11 = vsel %vm1604_vm2, %v3146_v55, %v2050_v27  ;;  %v1481_v51 = vsel %vm1220_vm1, %v1480_v10, %v1216_v13  ;;  %v1664_v45 = vld [vmem:[%s3537_s3 + $0x178] sm:$0xff] }
 0x253   :  { %1701 = vmatmul.f32.vlgmr.msra.gmra.mxu2 %v1605_v38  ;;  %1727 = vmatmul.f32.vlgmr.msra.gmra.mxu3 %v1608_v11  ;;  %v1491_v26 = vperm.slane %v1483_v47, %v3094_v34  ;;  %v1455_v59 = vperm.slane %v1447_v29, %v3094_v34  ;;  %v1494_v55 = vrot.slane %v1451_v48, 4  ;;  %v1487_v61 = vperm.slane %v1481_v51, %v3094_v34  ;;  %v1680_v47 = vld [vmem:[%s3537_s3 + $0x1f8] sm:$0xff]  ;;  %v1679_v38 = vld [vmem:[%s3537_s3 + $0x1f0] sm:$0xff]  ;;  %v1662_v48 = vld [vmem:[%s3537_s3 + $0x168] sm:$0xff] }
 0x254   :  { %v1193_v60 = vadd.f32 %v3069_v44, %v1165_v42  ;;  %v1663_v42 = vld [vmem:[%s3537_s3 + $0x170] sm:$0xff]  ;;  %1737 = vmatpush.msrb.mxu2 %v1664_v45  ;;  %1763 = vmatpush.msrb.mxu3 %v1680_v47  ;;  %v1793_v47 = vld [vmem:[%s3539_s5 + $0x8] sm:$0xff] }
 0x255   :  { %v1528_v8 = vrot.slane %v1491_v26, 4  ;;  %v1495_v44 = vsel %vm1220_vm1, %v1463_v57, %v1494_v55  ;;  %v1506_v25 = vrot.slane %v1455_v59, 4  ;;  %v1516_v49 = vrot.slane %v1487_v61, 4  ;;  %v1675_v55 = vld [vmem:[%s3537_s3 + $0x1d0] sm:$0xff] }
 0x256   :  { %v1217_v12 = vmax.f32 %v1193_v60, 0.0  ;;  %v1503_v5 = vperm.slane %v1495_v44, %v3112_v36  ;;  %v1505_v39 = vsel %vm1220_vm1, %v1504_v14, %v1455_v59  ;;  %1738 = vmatpush.msrb.mxu2 %v1663_v42  ;;  %1764 = vmatpush.msrb.mxu3 %v1679_v38  ;;  %v1661_v60 = vld [vmem:[%s3537_s3 + $0x160] sm:$0xff]  ;;  %v1676_v59 = vld [vmem:[%s3537_s3 + $0x1d8] sm:$0xff]  ;;  %v1674_v14 = vld [vmem:[%s3537_s3 + $0x1c8] sm:$0xff] }
 0x257   :  { %v1511_v43 = vperm.slane %v1505_v39, %v3112_v36  ;;  %v1671_v44 = vld [vmem:[%s3537_s3 + $0x1b0] sm:$0xff]  ;;  %v1668_v39 = vld [vmem:[%s3537_s3 + $0x198] sm:$0xff] }
 0x258   :  { %v1468_v56 = vrot.slane %v1217_v12, 4  ;;  %v1471_v17 = vsel %vm1220_vm1, %v1217_v12, %v1470_v54  ;;  %v1546_v46 = vrot.slane %v1503_v5, 4  ;;  %1739 = vmatpush.msrb.mxu2 %v1662_v48  ;;  %v1660_v54 = vld [vmem:[%s3537_s3 + $0x158] sm:$0xff]  ;;  %v1659_v12 = vld [vmem:[%s3537_s3 + $0x150] sm:$0xff] }
 0x259   :  { %v1479_v18 = vperm.slane %v1471_v17, %v3094_v34  ;;  %v1550_v11 = vrot.slane %v1511_v43, 4  ;;  %v1673_v17 = vld [vmem:[%s3537_s3 + $0x1c0] sm:$0xff] }
 0x25a   :  { %v1469_v62 = vsel %vm1220_vm1, %v1468_v56, %v1215_v40  ;;  %1740 = vmatpush.msrb.mxu2 %v1661_v60  ;;  %v1657_v56 = vld [vmem:[%s3537_s3 + $0x140] sm:$0xff] }
 0x25b   :  { %v1475_v52 = vperm.slane %v1469_v62, %v3094_v34  ;;  %v1530_v6 = vrot.slane %v1479_v18, 4  ;;  %v1529_v1 = vsel %vm1220_vm1, %v1528_v8, %v1479_v18  ;;  %v1507_v34 = vsel %vm1220_vm1, %v1467_v24, %v1506_v25  ;;  %v1678_v24 = vld [vmem:[%s3537_s3 + $0x1e8] sm:$0xff]  ;;  %v1656_v8 = vld [vmem:[%s3537_s3 + $0x138] sm:$0xff] }
 0x25c   :  { %v1535_v7 = vperm.slane %v1529_v1, %v3112_v36  ;;  %v1515_v9 = vperm.slane %v1507_v34, %v3112_v36  ;;  %1765 = vmatpush.msrb.mxu3 %v1678_v24  ;;  %1741 = vmatpush.msrb.mxu2 %v1660_v54  ;;  %v1672_v18 = vld [vmem:[%s3537_s3 + $0x1b8] sm:$0xff]  ;;  %v1654_v1 = vld [vmem:[%s3537_s3 + $0x128] sm:$0xff]  ;;  %v1665_v34 = vld [vmem:[%s3537_s3 + $0x180] sm:$0xff] }
 0x25d   :  { %v1518_v20 = vrot.slane %v1475_v52, 4  ;;  %v1517_v19 = vsel %vm1220_vm1, %v1516_v49, %v1475_v52  ;;  %v1531_v31 = vsel %vm1220_vm1, %v1491_v26, %v1530_v6  ;;  %v1677_v26 = vld [vmem:[%s3537_s3 + $0x1e0] sm:$0xff] }
 0x25e   :  { %v1523_v22 = vperm.slane %v1517_v19, %v3112_v36  ;;  %v1539_v53 = vperm.slane %v1531_v31, %v3112_v36  ;;  %v1548_v13 = vrot.slane %v1535_v7, 4  ;;  %v1551_v51 = vsel %vm1220_vm1, %v1535_v7, %v1550_v11  ;;  %1766 = vmatpush.msrb.mxu3 %v1677_v26  ;;  %1742 = vmatpush.msrb.mxu2 %v1659_v12  ;;  %v1651_v7 = vld [vmem:[%s3537_s3 + $0x110] sm:$0xff]  ;;  %v1650_v19 = vld [vmem:[%s3537_s3 + $0x108] sm:$0xff] }
 0x25f   :  { %v1519_v2 = vsel %vm1220_vm1, %v1487_v61, %v1518_v20  ;;  %v1658_v61 = vld [vmem:[%s3537_s3 + $0x148] sm:$0xff]  ;;  %v1667_v20 = vld [vmem:[%s3537_s3 + $0x190] sm:$0xff] }
 0x260   :  { %v1527_v41 = vperm.slane %v1519_v2, %v3112_v36  ;;  %v1540_v4 = vrot.slane %v1523_v22, 4  ;;  %v3377_v16 = vsel %vm1220_vm1, %v1548_v13, %v1511_v43  ;;  %v1552_v21 = vrot.slane %v1539_v53, 4  ;;  %1767 = vmatpush.msrb.mxu3 %v1676_v59  ;;  %1743 = vmatpush.msrb.mxu2 %v1658_v61  ;;  %v1666_v31 = vld [vmem:[%s3537_s3 + $0x188] sm:$0xff] }
 0x261   :  { %v1543_v10 = vsel %vm1220_vm1, %v1523_v22, %v1542_v23  ;;  %v1554_v36 = vrot.slane %v1515_v9, 4  ;;  %v1649_v22 = vld [vmem:[%s3537_s3 + $0x100] sm:$0xff]  ;;  %v2063_v23 = vpop.permute.xlu0 %2062 }
 0x262   :  { %v1547_v27 = vsel %vm1220_vm1, %v1527_v41, %v1546_v46  ;;  %v3382_v35 = vsel %vm1220_vm1, %v1540_v4, %v1499_v50  ;;  %v1544_v37 = vrot.slane %v1527_v41, 4  ;;  %v3385_v15 = vsel %vm1220_vm1, %v1552_v21, %v1515_v9  ;;  %1768 = vmatpush.msrb.mxu3 %v1675_v55  ;;  %1744 = vmatpush.msrb.mxu2 %v1657_v56  ;;  %v1670_v50 = vld [vmem:[%s3537_s3 + $0x1a8] sm:$0xff] }
 0x263   :  { %v2056_v40 = vpack.i.bf16 %v1547_v27, %v1543_v10  ;;  %v1555_v29 = vsel %vm1220_vm1, %v1539_v53, %v1554_v36  ;;  %v2065_v46 = vunpack.i.h.bf16 %v2063_v23  ;;  %v2064_v4 = vunpack.i.l.bf16 %v2063_v23 }
 0x264   :  { %v3388_v57 = vsel %vm1220_vm1, %v1544_v37, %v1503_v5  ;;  %v2071_v0 = vpack.i.bf16 %v1555_v29, %v1551_v51  ;;  %1769 = vmatpush.msrb.mxu3 %v1674_v14  ;;  %1745 = vmatpush.msrb.mxu2 %v1656_v8  ;;  %v1653_v5 = vld [vmem:[%s3537_s3 + $0x120] sm:$0xff] }
 0x265   :  { %2057 = vrot.lane.b32.xlu2 %v2056_v40, %s2105_s19  ;;  %v1614_v9 = vsel %vm1604_vm2, %v3139_v28, %v2065_v46  ;;  %v1611_v21 = vsel %vm1604_vm2, %v3149_v58, %v2064_v4  ;;  %v2077_v29 = vld [vmem:[%s3538_s4] ss:$0 sm:$0xff] }
 0x266   :  { %1770 = vmatpush.msrb.mxu3 %v1673_v17  ;;  %1746 = vmatpush.msrb.mxu2 %v1655_v33 }
 0x268   :  { %1771 = vmatpush.msrb.mxu3 %v1672_v18  ;;  %1747 = vmatpush.msrb.mxu2 %v1654_v1  ;;  %v2078_v1 = vld [vmem:[%s3540_s6] ss:$0 sm:$0xff] }
 0x26a   :  { %1772 = vmatpush.msrb.mxu3 %v1671_v44  ;;  %1748 = vmatpush.msrb.mxu2 %v1653_v5 }
 0x26c   :  { %1773 = vmatpush.msrb.mxu3 %v1670_v50 }
 0x26d   :  { %2072 = vrot.lane.b32.xlu2 %v2071_v0, %s2105_s19  ;;  %s2109_s19 = smov 128  }
 0x27d   :  { %v2053_v25 = vpop.permute.xlu1 %2052 }
 0x27e   :  { %v2055_v62 = vunpack.i.h.bf16 %v2053_v25  ;;  %v2054_v49 = vunpack.i.l.bf16 %v2053_v25 }
 0x280   :  { %v1606_v52 = vsel %vm1604_vm2, %v3241_v30, %v2054_v49  ;;  %v1609_v6 = vsel %vm1604_vm2, %v3237_v63, %v2055_v62  ;;  %v1669_v63 = vld [vmem:[%s3537_s3 + $0x1a0] sm:$0xff]  ;;  %v1652_v30 = vld [vmem:[%s3537_s3 + $0x118] sm:$0xff] }
 0x281   :  { %1704 = vmatmul.f32.gmra.mxu2 %v1606_v52  ;;  %1730 = vmatmul.f32.gmra.mxu3 %v1609_v6 }
 0x282   :  { %1774 = vmatpush.msrb.mxu3 %v1669_v63  ;;  %1749 = vmatpush.msrb.mxu2 %v1652_v30 }
 0x284   :  { %1775 = vmatpush.msrb.mxu3 %v1668_v39  ;;  %1750 = vmatpush.msrb.mxu2 %v1651_v7 }
 0x285   :  { %v2068_v10 = vpop.permute.xlu1 %2067 }
 0x286   :  { %1776 = vmatpush.msrb.mxu3 %v1667_v20  ;;  %1751 = vmatpush.msrb.mxu2 %v1650_v19  ;;  %v2070_v27 = vunpack.i.h.bf16 %v2068_v10  ;;  %v2069_v37 = vunpack.i.l.bf16 %v2068_v10 }
 0x288   :  { %1777 = vmatpush.msrb.mxu3 %v1666_v31  ;;  %1752 = vmatpush.msrb.mxu2 %v1649_v22  ;;  %v1615_v40 = vsel %vm1604_vm2, %v3244_v3, %v2070_v27  ;;  %v1794_v3 = vld [vmem:[%s3539_s5 + $0x10] sm:$0xff] }
 0x28a   :  { %1778 = vmatpush.msrb.mxu3 %v1665_v34 }
 0x2bf   :  { %v2058_v53 = vpop.permute.xlu2 %2057 }
 0x2c0   :  { %v2060_v13 = vunpack.i.h.bf16 %v2058_v53  ;;  %v2059_v2 = vunpack.i.l.bf16 %v2058_v53 }
 0x2c2   :  { %v1607_v43 = vsel %vm1604_vm2, %v3382_v35, %v2059_v2  ;;  %v1610_v41 = vsel %vm1604_vm2, %v3388_v57, %v2060_v13  ;;  %v1612_v35 = vsel %vm1604_vm2, %v3247_v32, %v2069_v37  ;;  %v1795_v32 = vld [vmem:[%s3539_s5 + $0x18] sm:$0xff] }
 0x2c3   :  { %1707 = vmatmul.f32.gmra.mxu2 %v1607_v43  ;;  %1733 = vmatmul.f32.gmra.mxu3 %v1610_v41 }
 0x2c4   :  { %1822 = vmatpush.msra.mxu2 %v1795_v32 }
 0x2c6   :  { %1823 = vmatpush.msra.mxu2 %v1794_v3 }
 0x2c7   :  { %v2073_v57 = vpop.permute.xlu2 %2072 }
 0x2c8   :  { %v2075_v36 = vunpack.i.h.bf16 %v2073_v57  ;;  %v2074_v45 = vunpack.i.l.bf16 %v2073_v57  ;;  %1824 = vmatpush.msra.mxu2 %v1793_v47 }
 0x2ca   :  { %v1613_v28 = vsel %vm1604_vm2, %v3377_v16, %v2074_v45  ;;  %v1616_v58 = vsel %vm1604_vm2, %v3385_v15, %v2075_v36  ;;  %v1792_v16 = vld [vmem:[%s3539_s5] sm:$0xff] }
 0x2cb   :  { %1753 = vmatmul.f32.vlgmr.msrb.gmra.mxu2 %v1611_v21  ;;  %1779 = vmatmul.f32.vlgmr.msrb.gmra.mxu3 %v1614_v9 }
 0x2cc   :  { %1825 = vmatpush.msra.mxu2 %v1792_v16 }
 0x2d3   :  { %1756 = vmatmul.f32.gmra.mxu2 %v1612_v35  ;;  %1782 = vmatmul.f32.gmra.mxu3 %v1615_v40 }
 0x2d6   :  { %v1702_v15 = vpop.f32.mrf.mxu2  ;;  %v1728_v42 = vpop.f32.mrf.mxu3 }
 0x2d7   :  { %v1703_v51 = vadd.f32 %v2077_v29, %v1702_v15 }
 0x2d9   :  { %v1729_v60 = vadd.f32 %v1728_v42, %v1703_v51 }
 0x2db   :  { %1759 = vmatmul.f32.gmra.mxu2 %v1613_v28  ;;  %1785 = vmatmul.f32.gmra.mxu3 %v1616_v58 }
 0x304   :  { %v1705_v38 = vpop.f32.mrf.mxu2  ;;  %v1731_v11 = vpop.f32.mrf.mxu3 }
 0x305   :  { %v1706_v59 = vadd.f32 %v2077_v29, %v1705_v38 }
 0x307   :  { %v1732_v61 = vadd.f32 %v1731_v11, %v1706_v59 }
 0x346   :  { %v1708_v48 = vpop.f32.mrf.mxu2  ;;  %v1734_v24 = vpop.f32.mrf.mxu3 }
 0x347   :  { %v1709_v8 = vadd.f32 %v2077_v29, %v1708_v48 }
 0x349   :  { %v1735_v44 = vadd.f32 %v1734_v24, %v1709_v8 }
 0x34e   :  { %v1754_v0 = vpop.f32.mrf.mxu2  ;;  %v1780_v26 = vpop.f32.mrf.mxu3 }
 0x34f   :  { %v1755_v54 = vadd.f32 %v1754_v0, %v1729_v60 }
 0x351   :  { %v1781_v12 = vadd.f32 %v1780_v26, %v1755_v54 }
 0x353   :  { %v1789_v55 = vmax.f32 %v1781_v12, 0.0 }
 0x355   :  { %2019 = vmatmul.msk.f32.vlgmr.msra.gmra.mxu2 %vm1800_vm3, %v1789_v55 }
 0x356   :  { %v1757_v14 = vpop.f32.mrf.mxu2  ;;  %v1783_v56 = vpop.f32.mrf.mxu3 }
 0x357   :  { %v1758_v17 = vadd.f32 %v1757_v14, %v1732_v61 }
 0x359   :  { %v1784_v18 = vadd.f32 %v1783_v56, %v1758_v17 }
 0x35b   :  { %v1790_v33 = vmax.f32 %v1784_v18, 0.0 }
 0x35d   :  { %2020 = vmatmul.msk.f32.gmra.mxu2 %vm1800_vm3, %v1790_v33 }
 0x35e   :  { %v1760_v25 = vpop.f32.mrf.mxu2  ;;  %v1786_v49 = vpop.f32.mrf.mxu3 }
 0x35f   :  { %v1761_v62 = vadd.f32 %v1760_v25, %v1735_v44 }
 0x361   :  { %v1787_v52 = vadd.f32 %v1786_v49, %v1761_v62 }
 0x363   :  { %v1791_v6 = vmax.f32 %v1787_v52, 0.0 }
 0x365   :  { %2021 = vmatmul.msk.f32.gmra.mxu2 %vm1800_vm3, %v1791_v6 }
 0x3d8   :  { %v1827_v50 = vpop.f32.mrf.mxu2 }
 0x3d9   :  { %v1828_v5 = vadd.f32 %v2078_v1, %v1827_v50 }
 0x3db   :  { %1836 = vst [vmem:[#allocation2] sm:$0xff] %v1828_v5 }
 0x3e0   :  { %v1830_v63 = vpop.f32.mrf.mxu2 }
 0x3e1   :  { %v1831_v30 = vadd.f32 %v2078_v1, %v1830_v63 }
 0x3e3   :  { %1837 = vst [vmem:[#allocation2 + $0x8] sm:$0xff] %v1831_v30 }
 0x3e8   :  { %v1833_v39 = vpop.f32.mrf.mxu2 }
 0x3e9   :  { %v1834_v7 = vadd.f32 %v2078_v1, %v1833_v39 }
 0x3eb   :  { %1838 = vst [vmem:[#allocation2 + $0x10] sm:$0xff] %v1834_v7 }
 0x3ec   :  { %1851 = dma.vmem_to_hbm [thread:$0]  %s1844_s22, 384, %s1846_s25, [#allocation3], %s2109_s19, %s2109_s19, %s2110_s26  }
 0x3ed   :  { %2103 = dma.done.wait [#allocation3], 384  }
 0x3ee   :  { %2104 = vsyncadd [#allocation3], 4294966912 }
 0x3ef   :  { %1856 = vsyncpa [#allocation3], 1 }

</bundles_post_ra>
